<compile_context>
chip_gen: v7x
topology: tpu7x:2x2x1
jax: 0.10.0
libtpu: 0.0.40
codegen_flags: <defaults>
</compile_context>

<pallas_src>
import functools

import numpy as np
import jax
import jax.numpy as jnp
from jax.experimental import pallas as pl
from jax.experimental.pallas import tpu as pltpu


# ----------------------------------------------------------------------------
# helpers
# ----------------------------------------------------------------------------
def _vmem_limit_bytes():
    """Generation-dependent scoped-VMEM limit (None -> compiler default)."""
    try:
        kind = jax.devices()[0].device_kind.lower()
    except Exception:
        return None
    if "v7" in kind or "tpu7" in kind:
        return 48 * 1024 * 1024            # 64 MiB physical on v7x, keep headroom
    if "v4" in kind or "v5" in kind or "v6" in kind:
        return 96 * 1024 * 1024            # 128 MiB physical on v4/v5e/v6e
    return None


def _compiler_params(dim_semantics):
    kwargs = dict(dimension_semantics=dim_semantics)
    lim = _vmem_limit_bytes()
    if lim is not None:
        kwargs["vmem_limit_bytes"] = lim
    return pltpu.CompilerParams(**kwargs)


def _pick_group_size(n_heads, head_dim, max_cols=256):
    """Largest divisor of n_heads with Hg*head_dim <= max_cols (MXU width)."""
    hg = 1
    for cand in range(2, n_heads + 1):
        if n_heads % cand == 0 and cand * head_dim <= max_cols:
            hg = cand
    return hg


# ----------------------------------------------------------------------------
# Kernel 1: fused GSA layer, one (batch, head-group) tile per grid point.
#   grid = (B, G); G (head groups) is the accumulation ("arbitrary") axis: the
#   output block stays resident across groups and accumulates
#       out = x + sum_g  head_out_g @ Wout_g .
# ----------------------------------------------------------------------------
def gsa_layer_kernel(x_ref, gamma_ref, beta_ref, wqkv_ref, wout_ref,
                     csc_ref, inv_ref, bias_ref,
                     o_ref, xn_ref, ho_ref,
                     *, n_heads_grp, head_dim, n_splats):
    g = pl.program_id(1)
    Gd = n_heads_grp * head_dim

    @pl.when(g == 0)
    def _():
        # LayerNorm(x) once per batch row (f32 math, cached as bf16), residual init.
        x = x_ref[0]                                              # (T, D) f32
        mean = jnp.mean(x, axis=-1, keepdims=True)
        xc = x - mean
        var = jnp.mean(xc * xc, axis=-1, keepdims=True)
        xn = (xc * jax.lax.rsqrt(var + 1e-5)) * gamma_ref[...] + beta_ref[...]
        xn_ref[...] = xn.astype(jnp.bfloat16)
        o_ref[0] = x                                              # residual

    xn = xn_ref[...]                                              # (T, D) bf16

    # fused per-group Q/K/V projection: one MXU pass with N = 3*Hg*hd
    qkv = jnp.dot(xn, wqkv_ref[0], preferred_element_type=jnp.float32)  # (T, 3*Gd)
    q = qkv[:, 0 * Gd:1 * Gd].astype(jnp.bfloat16)
    k = qkv[:, 1 * Gd:2 * Gd].astype(jnp.bfloat16)
    v = qkv[:, 2 * Gd:3 * Gd].astype(jnp.bfloat16)

    csc = csc_ref[0]          # (Gd, Hg*S) bf16  block-diag  2*c/(2 s^2)
    invm = inv_ref[0]         # (Gd, Hg*S) bf16  block-diag  1/(2 s^2)
    bias = bias_ref[0]        # (2, Hg*S)  f32   [log(amp/temp)-c_term ; -c_term]
    bias_q = bias[0:1, :]
    bias_k = bias[1:2, :]

    # splat weights, entirely on the MXU:
    #   exponent = q . (2*c/(2s^2))  -  (q*q) . (1/(2s^2))  +  bias
    q_w = jnp.exp(jnp.dot(q, csc, preferred_element_type=jnp.float32)
                  - jnp.dot(q * q, invm, preferred_element_type=jnp.float32)
                  + bias_q)                                       # (T, Hg*S) f32
    k_w = jnp.exp(jnp.dot(k, csc, preferred_element_type=jnp.float32)
                  - jnp.dot(k * k, invm, preferred_element_type=jnp.float32)
                  + bias_k)                                       # (T, Hg*S) f32

    dn = (((1,), (1,)), ((), ()))
    # per-head attention inside the group (logits/softmax are inherently per head)
    for hh in range(n_heads_grp):
        qw_h = q_w[:, hh * n_splats:(hh + 1) * n_splats].astype(jnp.bfloat16)
        kw_h = k_w[:, hh * n_splats:(hh + 1) * n_splats].astype(jnp.bfloat16)
        logits = jax.lax.dot_general(qw_h, kw_h, dn,
                                     preferred_element_type=jnp.float32)   # (T, T)
        m = jnp.max(logits, axis=-1, keepdims=True)
        p = jnp.exp(logits - m)
        # NOTE: approx reciprocal -> rows sum to 1 only to ~1e-3 relative.
        attn = (p * pl.reciprocal(jnp.sum(p, axis=-1, keepdims=True),
                                  approx=True)).astype(jnp.bfloat16)
        v_h = v[:, hh * head_dim:(hh + 1) * head_dim]
        ho = jnp.dot(attn, v_h, preferred_element_type=jnp.float32)        # (T, hd)
        ho_ref[:, hh * head_dim:(hh + 1) * head_dim] = ho.astype(jnp.bfloat16)

    # grouped out-projection (K = Hg*hd) accumulated into the residual
    o_ref[0] = o_ref[0] + jnp.dot(ho_ref[...], wout_ref[0],
                                  preferred_element_type=jnp.float32)


def gsa_layer_prep(p):
    """Host-side (plain JAX) per-forward parameter glue (cheap, runs once)."""
    H, S, hd = p["splat_centers"].shape
    G = p["wqkv_grp"].shape[0]
    Hg = H // G

    centers = (p["splat_centers"]
               + p["splat_deltas"] * jax.nn.sigmoid(p["movement_scale"]) * 0.2)  # (H,S,hd)
    scales = jnp.clip(jnp.exp(p["splat_log_scales"]), 0.01, 2.0)                 # (H,S)
    amps = jnp.clip(jnp.exp(p["splat_log_amplitudes"]), 1e-6, 10.0)              # (H,S)
    temp = jnp.clip(p["temperature"], 0.1, 10.0)

    inv2s2 = 0.5 / (scales ** 2 + 1e-8)                                          # (H,S)
    c_term = jnp.sum(centers ** 2, axis=-1) * inv2s2                             # (H,S)

    # pre-scaled centers so the MXU cross term gives  2*q.c/(2 s^2)  directly
    csc = jnp.transpose(2.0 * centers * inv2s2[:, :, None], (0, 2, 1))           # (H,hd,S)
    invm = jnp.broadcast_to(inv2s2[:, None, :], (H, hd, S))                      # (H,hd,S)

    eye = jnp.eye(Hg, dtype=jnp.float32)

    def block_diag(m):        # (H, hd, S) -> (G, Hg*hd, Hg*S), per-group block-diag
        m = m.reshape(G, Hg, hd, S)
        bd = jnp.einsum("ab,gahs->gahbs", eye, m)
        return bd.reshape(G, Hg * hd, Hg * S)

    csc_bd = block_diag(csc).astype(jnp.bfloat16)
    inv_bd = block_diag(invm).astype(jnp.bfloat16)

    bias_q = (jnp.log(amps / temp) - c_term).reshape(G, 1, Hg * S)               # amp fold
    bias_k = (-c_term).reshape(G, 1, Hg * S)
    bias = jnp.concatenate([bias_q, bias_k], axis=1)                             # (G,2,Hg*S)
    return csc_bd, inv_bd, bias


def gsa_layer_forward(p, x):
    """GSALayer.forward (eval: dropout = identity): x + out_proj(GSA(LN(x)))."""
    B, T, D = x.shape
    H, S, hd = p["splat_centers"].shape
    G = p["wqkv_grp"].shape[0]
    Hg = H // G
    Gd = Hg * hd
    GS = Hg * S
    csc_bd, inv_bd, bias = gsa_layer_prep(p)

    kernel = functools.partial(gsa_layer_kernel, n_heads_grp=Hg,
                               head_dim=hd, n_splats=S)
    return pl.pallas_call(
        kernel,
        out_shape=jax.ShapeDtypeStruct((B, T, D), jnp.float32),
        grid=(B, G),
        in_specs=[
            pl.BlockSpec((1, T, D), lambda b, g: (b, 0, 0)),          # x
            pl.BlockSpec((1, D), lambda b, g: (0, 0)),                # ln gamma
            pl.BlockSpec((1, D), lambda b, g: (0, 0)),                # ln beta
            pl.BlockSpec((1, D, 3 * Gd), lambda b, g: (g, 0, 0)),     # fused Wqkv (bf16)
            pl.BlockSpec((1, Gd, D), lambda b, g: (g, 0, 0)),         # grouped Wout (bf16)
            pl.BlockSpec((1, Gd, GS), lambda b, g: (g, 0, 0)),        # 2*c/(2s^2) block-diag
            pl.BlockSpec((1, Gd, GS), lambda b, g: (g, 0, 0)),        # 1/(2s^2)   block-diag
            pl.BlockSpec((1, 2, GS), lambda b, g: (g, 0, 0)),         # packed biases
        ],
        out_specs=pl.BlockSpec((1, T, D), lambda b, g: (b, 0, 0)),
        scratch_shapes=[pltpu.VMEM((T, D), jnp.bfloat16),             # cached LN(x)
                        pltpu.VMEM((T, Gd), jnp.bfloat16)],           # per-group head outs
        compiler_params=_compiler_params(("parallel", "arbitrary")),
    )(x, p["ln_gamma"], p["ln_beta"], p["wqkv_grp"], p["wout_grp"],
      csc_bd, inv_bd, bias)


# ----------------------------------------------------------------------------
# Kernel 2: final LayerNorm + tied LM head (logits = LN(x) @ wte.T), V/T tiled.
#   grid = (B, V_tiles, T_tiles): the (D, Vt) weight tile stays resident across
#   the inner T-tile axis; LN is recomputed per tile (negligible vs the matmul).
# ----------------------------------------------------------------------------
def lnf_head_kernel(x_ref, gamma_ref, beta_ref, wte_t_ref, o_ref):
    x = x_ref[0]                                                   # (Tt, D) f32
    mean = jnp.mean(x, axis=-1, keepdims=True)
    xc = x - mean
    var = jnp.mean(xc * xc, axis=-1, keepdims=True)
    xn = (xc * jax.lax.rsqrt(var + 1e-5)) * gamma_ref[...] + beta_ref[...]
    o_ref[0] = jnp.dot(xn.astype(jnp.bfloat16), wte_t_ref[...],
                       preferred_element_type=jnp.float32)


def final_ln_lm_head(x, gamma, beta, wte_t_bf16, *, v_tile=2048, t_tile=256):
    B, T, D = x.shape
    V = wte_t_bf16.shape[1]
    vt = min(v_tile, V)
    tt = min(t_tile, T)
    return pl.pallas_call(
        lnf_head_kernel,
        out_shape=jax.ShapeDtypeStruct((B, T, V), jnp.float32),
        grid=(B, pl.cdiv(V, vt), pl.cdiv(T, tt)),
        in_specs=[
            pl.BlockSpec((1, tt, D), lambda b, vi, ti: (b, ti, 0)),
            pl.BlockSpec((1, D), lambda b, vi, ti: (0, 0)),
            pl.BlockSpec((1, D), lambda b, vi, ti: (0, 0)),
            pl.BlockSpec((D, vt), lambda b, vi, ti: (0, vi)),
        ],
        out_specs=pl.BlockSpec((1, tt, vt), lambda b, vi, ti: (b, ti, vi)),
        compiler_params=_compiler_params(("parallel", "arbitrary", "arbitrary")),
    )(x, gamma, beta, wte_t_bf16)


# ----------------------------------------------------------------------------
# Deterministic parameter init (mirrors the PyTorch __init__)
# ----------------------------------------------------------------------------
def xavier_uniform(key, shape, gain):
    fan_out, fan_in = shape
    bound = gain * np.sqrt(6.0 / (fan_in + fan_out))
    return jax.random.uniform(key, shape, jnp.float32, -bound, bound)


def init_gsa_layer(key, dim, n_heads, n_splats, scale_init=0.5,
                   movement_scale=0.08, temperature_init=1.0):
    head_dim = dim // n_heads
    hg = _pick_group_size(n_heads, head_dim)
    G = n_heads // hg
    ks = jax.random.split(key, 5)
    w_qkv = xavier_uniform(ks[0], (3 * dim, dim), gain=0.5)        # torch Linear layout
    w_out = xavier_uniform(ks[1], (dim, dim), gain=0.5)
    w_qkv_t = w_qkv.T                                              # (D, 3D)  for x @ W^T
    w_out_t = w_out.T                                              # (D, D)
    # grouped bf16 weight layouts for the fused kernel:
    #   (D, 3D) -> (G, D, 3*Hg*hd)  column order [q heads | k heads | v heads]
    wqkv_grp = (w_qkv_t.reshape(dim, 3, G, hg * head_dim)
                .transpose(2, 0, 1, 3)
                .reshape(G, dim, 3 * hg * head_dim)).astype(jnp.bfloat16)
    #   (D, D) -> (G, Hg*hd, D)     row block of the output projection per group
    wout_grp = w_out_t.reshape(G, hg * head_dim, dim).astype(jnp.bfloat16)
    return {
        "splat_centers": jax.random.normal(ks[2], (n_heads, n_splats, head_dim)) * 0.2,
        "splat_deltas": jnp.zeros((n_heads, n_splats, head_dim), jnp.float32),
        "splat_log_scales": jax.random.normal(ks[3], (n_heads, n_splats)) * 0.2 + np.log(scale_init),
        "splat_log_amplitudes": jax.random.normal(ks[4], (n_heads, n_splats)) * 0.1 - 0.5,
        "movement_scale": jnp.asarray(movement_scale, jnp.float32),
        "temperature": jnp.asarray(temperature_init, jnp.float32),
        "w_qkv_t": w_qkv_t,                 # f32 (reference / export)
        "w_out_t": w_out_t,                 # f32 (reference / export)
        "wqkv_grp": wqkv_grp,               # bf16 kernel layout
        "wout_grp": wout_grp,               # bf16 kernel layout
        "ln_gamma": jnp.ones((1, dim), jnp.float32),
        "ln_beta": jnp.zeros((1, dim), jnp.float32),
    }


def init_wrapper(key, *, vocab, dim, n_heads, n_layers,
                 original_max_pos, max_context_length):
    # n_splats_per_head = max(8, min(32, max_context_length // 128))
    n_splats = max(8, min(32, max_context_length // 128))
    ks = jax.random.split(key, n_layers + 2)
    wte = jax.random.normal(ks[0], (vocab, dim)) * 0.02
    wpe_old = jax.random.normal(ks[1], (original_max_pos, dim)) * 0.02
    # _extend_positions: copy old, then wrap-around * 0.95
    if max_context_length > original_max_pos:
        idx = jnp.arange(original_max_pos, max_context_length) % original_max_pos
        wpe = jnp.concatenate([wpe_old, wpe_old[idx] * 0.95], axis=0)
    else:
        wpe = wpe_old
    layers = [init_gsa_layer(ks[2 + i], dim, n_heads, n_splats) for i in range(n_layers)]
    return {
        "wte": wte, "wpe": wpe, "layers": layers,
        "wte_t_bf16": wte.T.astype(jnp.bfloat16),      # tied LM head weight (bf16)
        "lnf_gamma": jnp.ones((1, dim), jnp.float32),
        "lnf_beta": jnp.zeros((1, dim), jnp.float32),
    }


# ----------------------------------------------------------------------------
# GSAModelWrapper.forward : embeddings -> GSA layers -> final LN -> LM head
# ----------------------------------------------------------------------------
def wrapper_forward(params, input_ids):
    B, T = input_ids.shape
    # TODO(synk): token/position embedding gather stays in plain JAX (data-dependent gather).
    x = params["wte"][input_ids] + params["wpe"][:T][None, :, :]
    for lp in params["layers"]:
        x = gsa_layer_forward(lp, x)
    return final_ln_lm_head(x, params["lnf_gamma"], params["lnf_beta"],
                            params["wte_t_bf16"])


# ----------------------------------------------------------------------------
# Pure-JAX f32 references (torch-faithful), for correctness checks
# ----------------------------------------------------------------------------
def gsa_layer_ref(p, x):
    B, T, D = x.shape
    H, S, hd = p["splat_centers"].shape
    mean = jnp.mean(x, -1, keepdims=True)
    var = jnp.mean((x - mean) ** 2, -1, keepdims=True)
    xn = (x - mean) / jnp.sqrt(var + 1e-5) * p["ln_gamma"] + p["ln_beta"]
    qkv = (xn @ p["w_qkv_t"]).reshape(B, T, 3, H, hd)
    q, k, v = qkv[:, :, 0], qkv[:, :, 1], qkv[:, :, 2]
    centers = p["splat_centers"] + p["splat_deltas"] * jax.nn.sigmoid(p["movement_scale"]) * 0.2
    scales = jnp.clip(jnp.exp(p["splat_log_scales"]), 0.01, 2.0)
    amps = jnp.clip(jnp.exp(p["splat_log_amplitudes"]), 1e-6, 10.0)
    temp = jnp.clip(p["temperature"], 0.1, 10.0)
    qd = jnp.sum((q[:, :, :, None, :] - centers[None, None]) ** 2, -1)   # (B,T,H,S)
    kd = jnp.sum((k[:, :, :, None, :] - centers[None, None]) ** 2, -1)
    qw = jnp.exp(-0.5 * qd / (scales ** 2 + 1e-8))
    kw = jnp.exp(-0.5 * kd / (scales ** 2 + 1e-8))
    logits = jnp.einsum("bihs,bjhs,hs->bijh", qw, kw, amps)
    attn = jax.nn.softmax(logits / temp, axis=2)
    out = jnp.einsum("btjh,bjhd->bthd", attn, v).reshape(B, T, D)
    return x + out @ p["w_out_t"]


def lnf_head_ref(x, gamma, beta, wte):
    mean = jnp.mean(x, -1, keepdims=True)
    var = jnp.mean((x - mean) ** 2, -1, keepdims=True)
    xn = (x - mean) / jnp.sqrt(var + 1e-5) * gamma + beta
    return xn @ wte.T


if __name__ == "__main__":
    key = jax.random.PRNGKey(0)
    k_param, k_ids, k_x = jax.random.split(key, 3)

    VOCAB, DIM, HEADS, LAYERS = 64, 32, 4, 2
    ORIG_POS, MAX_CTX = 16, 32
    B, T = 2, 8

    params = init_wrapper(k_param, vocab=VOCAB, dim=DIM, n_heads=HEADS,
                          n_layers=LAYERS, original_max_pos=ORIG_POS,
                          max_context_length=MAX_CTX)

    input_ids = jax.random.randint(k_ids, (B, T), 0, VOCAB)
    logits = jax.block_until_ready(wrapper_forward(params, input_ids))
    assert logits.shape == (B, T, VOCAB)

    # sanity check 1: fused Pallas GSA layer vs pure-f32 JAX reference.
    # tolerance sized for bf16 MXU operands (q/k, q^2/k^2, scaled centers) plus
    # the approx softmax reciprocal; all accumulation is f32.
    x_test = jax.random.normal(k_x, (B, T, DIM), jnp.float32)
    lp = params["layers"][0]
    got = jax.block_until_ready(gsa_layer_forward(lp, x_test))
    want = gsa_layer_ref(lp, x_test)
    np.testing.assert_allclose(np.asarray(got), np.asarray(want),
                               rtol=4e-2, atol=4e-2)

    # sanity check 2: tiled final LN + LM head vs pure-f32 JAX reference.
    got_head = jax.block_until_ready(
        final_ln_lm_head(x_test, params["lnf_gamma"], params["lnf_beta"],
                         params["wte_t_bf16"]))
    want_head = lnf_head_ref(x_test, params["lnf_gamma"], params["lnf_beta"],
                             params["wte"])
    np.testing.assert_allclose(np.asarray(got_head), np.asarray(want_head),
                               rtol=3e-2, atol=3e-2)

    print("KERNEL_OK")
</pallas_src>

<mosaic_0001>
module attributes {stable_mosaic.version = 11 : i64} {
  func.func @gsa_layer_kernel(%arg0: i32, %arg1: i32, %arg2: memref<1x8x32xf32, #tpu.memory_space<vmem>>, %arg3: memref<1x32xf32, #tpu.memory_space<vmem>>, %arg4: memref<1x32xf32, #tpu.memory_space<vmem>>, %arg5: memref<1x32x96xbf16, #tpu.memory_space<vmem>>, %arg6: memref<1x32x32xbf16, #tpu.memory_space<vmem>>, %arg7: memref<1x32x32xbf16, #tpu.memory_space<vmem>>, %arg8: memref<1x32x32xbf16, #tpu.memory_space<vmem>>, %arg9: memref<1x2x32xf32, #tpu.memory_space<vmem>>, %arg10: memref<1x8x32xf32, #tpu.memory_space<vmem>>, %arg11: memref<8x32xbf16, #tpu.memory_space<vmem>>, %arg12: memref<8x32xbf16, #tpu.memory_space<vmem>>) attributes {dimension_semantics = [#tpu.dimension_semantics<parallel>, #tpu.dimension_semantics<arbitrary>], iteration_bounds = array<i64: 2, 1>, scalar_prefetch = 0 : i64, scratch_operands = 2 : i64, tpu.core_type = #tpu.core_type<tc>, window_params = [{transform_indices = @transform_0, window_bounds = array<i64: 1, 8, 32>}, {pipeline_mode = #tpu.pipeline_mode<synchronous>, transform_indices = @transform_1, window_bounds = array<i64: 1, 32>}, {pipeline_mode = #tpu.pipeline_mode<synchronous>, transform_indices = @transform_2, window_bounds = array<i64: 1, 32>}, {transform_indices = @transform_3, window_bounds = array<i64: 1, 32, 96>}, {transform_indices = @transform_4, window_bounds = array<i64: 1, 32, 32>}, {transform_indices = @transform_5, window_bounds = array<i64: 1, 32, 32>}, {transform_indices = @transform_6, window_bounds = array<i64: 1, 32, 32>}, {transform_indices = @transform_7, window_bounds = array<i64: 1, 2, 32>}, {transform_indices = @transform_8, window_bounds = array<i64: 1, 8, 32>}]} {
    %c0_i32 = arith.constant 0 : i32
    %0 = arith.cmpi eq, %arg1, %c0_i32 : i32
    %1 = arith.extui %0 : i1 to i32
    %c0_i32_0 = arith.constant 0 : i32
    %2 = arith.cmpi ne, %1, %c0_i32_0 : i32
    scf.if %2 {
      %c0_51 = arith.constant 0 : index
      %c0_52 = arith.constant 0 : index
      %c0_53 = arith.constant 0 : index
      %125 = vector.load %arg2[%c0_51, %c0_52, %c0_53] : memref<1x8x32xf32, #tpu.memory_space<vmem>>, vector<1x8x32xf32>
      %126 = vector.shape_cast %125 : vector<1x8x32xf32> to vector<8x32xf32>
      %cst_54 = arith.constant dense<0.000000e+00> : vector<8xf32>
      %127 = vector.multi_reduction <add>, %126, %cst_54 [1] : vector<8x32xf32> to vector<8xf32>
      %128 = vector.shape_cast %127 : vector<8xf32> to vector<8x1xf32>
      %cst_55 = arith.constant 3.200000e+01 : f32
      %129 = vector.broadcast %cst_55 : f32 to vector<8x1xf32>
      %130 = arith.divf %128, %129 : vector<8x1xf32>
      %131 = vector.broadcast %130 : vector<8x1xf32> to vector<8x32xf32>
      %132 = arith.subf %126, %131 : vector<8x32xf32>
      %133 = arith.mulf %132, %132 : vector<8x32xf32>
      %cst_56 = arith.constant dense<0.000000e+00> : vector<8xf32>
      %134 = vector.multi_reduction <add>, %133, %cst_56 [1] : vector<8x32xf32> to vector<8xf32>
      %135 = vector.shape_cast %134 : vector<8xf32> to vector<8x1xf32>
      %cst_57 = arith.constant 3.200000e+01 : f32
      %136 = vector.broadcast %cst_57 : f32 to vector<8x1xf32>
      %137 = arith.divf %135, %136 : vector<8x1xf32>
      %cst_58 = arith.constant 9.99999974E-6 : f32
      %138 = vector.broadcast %cst_58 : f32 to vector<8x1xf32>
      %139 = arith.addf %137, %138 : vector<8x1xf32>
      %140 = math.rsqrt %139 : vector<8x1xf32>
      %141 = vector.broadcast %140 : vector<8x1xf32> to vector<8x32xf32>
      %142 = arith.mulf %132, %141 : vector<8x32xf32>
      %c0_59 = arith.constant 0 : index
      %c0_60 = arith.constant 0 : index
      %143 = vector.load %arg3[%c0_59, %c0_60] : memref<1x32xf32, #tpu.memory_space<vmem>>, vector<1x32xf32>
      %144 = vector.broadcast %143 : vector<1x32xf32> to vector<8x32xf32>
      %145 = arith.mulf %142, %144 : vector<8x32xf32>
      %c0_61 = arith.constant 0 : index
      %c0_62 = arith.constant 0 : index
      %146 = vector.load %arg4[%c0_61, %c0_62] : memref<1x32xf32, #tpu.memory_space<vmem>>, vector<1x32xf32>
      %147 = vector.broadcast %146 : vector<1x32xf32> to vector<8x32xf32>
      %148 = arith.addf %145, %147 : vector<8x32xf32>
      %149 = arith.truncf %148 : vector<8x32xf32> to vector<8x32xbf16>
      %c0_63 = arith.constant 0 : index
      %c0_64 = arith.constant 0 : index
      %150 = vector.load %arg11[%c0_63, %c0_64] : memref<8x32xbf16, #tpu.memory_space<vmem>>, vector<8x32xbf16>
      tpu.vector_store %arg11[%c0_63, %c0_64], %149 {strides = array<i32>} : memref<8x32xbf16, #tpu.memory_space<vmem>>, vector<8x32xbf16>,
      %c0_65 = arith.constant 0 : index
      %c0_66 = arith.constant 0 : index
      %c0_67 = arith.constant 0 : index
      %151 = vector.load %arg10[%c0_65, %c0_66, %c0_67] : memref<1x8x32xf32, #tpu.memory_space<vmem>>, vector<1x8x32xf32>
      %152 = vector.shape_cast %151 : vector<1x8x32xf32> to vector<8x32xf32>
      %153 = vector.shape_cast %126 : vector<8x32xf32> to vector<1x8x32xf32>
      tpu.vector_store %arg10[%c0_65, %c0_66, %c0_67], %153 {strides = array<i32>} : memref<1x8x32xf32, #tpu.memory_space<vmem>>, vector<1x8x32xf32>,
    } else {
    }
    %c0 = arith.constant 0 : index
    %c0_1 = arith.constant 0 : index
    %3 = vector.load %arg11[%c0, %c0_1] : memref<8x32xbf16, #tpu.memory_space<vmem>>, vector<8x32xbf16>
    %c0_2 = arith.constant 0 : index
    %c0_3 = arith.constant 0 : index
    %c0_4 = arith.constant 0 : index
    %4 = vector.load %arg5[%c0_2, %c0_3, %c0_4] : memref<1x32x96xbf16, #tpu.memory_space<vmem>>, vector<1x32x96xbf16>
    %5 = vector.shape_cast %4 : vector<1x32x96xbf16> to vector<32x96xbf16>
    %cst = arith.constant dense<0.000000e+00> : vector<8x96xf32>
    %6 = tpu.matmul %3, %5, %cst {dimension_numbers = #tpu.dot_dimension_numbers<[1], [0], [0], [1], [0, 0, 1, 1], [], []>} : vector<8x32xbf16>, vector<32x96xbf16>, vector<8x96xf32> -> vector<8x96xf32>
    %7 = vector.extract_strided_slice %6 {offsets = [0, 0], sizes = [8, 32], strides = [1, 1]} : vector<8x96xf32> to vector<8x32xf32>
    %8 = arith.truncf %7 : vector<8x32xf32> to vector<8x32xbf16>
    %9 = vector.extract_strided_slice %6 {offsets = [0, 32], sizes = [8, 32], strides = [1, 1]} : vector<8x96xf32> to vector<8x32xf32>
    %10 = arith.truncf %9 : vector<8x32xf32> to vector<8x32xbf16>
    %11 = vector.extract_strided_slice %6 {offsets = [0, 64], sizes = [8, 32], strides = [1, 1]} : vector<8x96xf32> to vector<8x32xf32>
    %12 = arith.truncf %11 : vector<8x32xf32> to vector<8x32xbf16>
    %c0_5 = arith.constant 0 : index
    %c0_6 = arith.constant 0 : index
    %c0_7 = arith.constant 0 : index
    %13 = vector.load %arg7[%c0_5, %c0_6, %c0_7] : memref<1x32x32xbf16, #tpu.memory_space<vmem>>, vector<1x32x32xbf16>
    %14 = vector.shape_cast %13 : vector<1x32x32xbf16> to vector<32x32xbf16>
    %c0_8 = arith.constant 0 : index
    %c0_9 = arith.constant 0 : index
    %c0_10 = arith.constant 0 : index
    %15 = vector.load %arg8[%c0_8, %c0_9, %c0_10] : memref<1x32x32xbf16, #tpu.memory_space<vmem>>, vector<1x32x32xbf16>
    %16 = vector.shape_cast %15 : vector<1x32x32xbf16> to vector<32x32xbf16>
    %c0_11 = arith.constant 0 : index
    %c0_12 = arith.constant 0 : index
    %c0_13 = arith.constant 0 : index
    %17 = vector.load %arg9[%c0_11, %c0_12, %c0_13] : memref<1x2x32xf32, #tpu.memory_space<vmem>>, vector<1x2x32xf32>
    %18 = vector.shape_cast %17 : vector<1x2x32xf32> to vector<2x32xf32>
    %19 = vector.extract_strided_slice %18 {offsets = [0, 0], sizes = [1, 32], strides = [1, 1]} : vector<2x32xf32> to vector<1x32xf32>
    %20 = vector.extract_strided_slice %18 {offsets = [1, 0], sizes = [1, 32], strides = [1, 1]} : vector<2x32xf32> to vector<1x32xf32>
    %cst_14 = arith.constant dense<0.000000e+00> : vector<8x32xf32>
    %21 = tpu.matmul %8, %14, %cst_14 {dimension_numbers = #tpu.dot_dimension_numbers<[1], [0], [0], [1], [0, 0, 1, 1], [], []>} : vector<8x32xbf16>, vector<32x32xbf16>, vector<8x32xf32> -> vector<8x32xf32>
    %22 = arith.mulf %8, %8 : vector<8x32xbf16>
    %cst_15 = arith.constant dense<0.000000e+00> : vector<8x32xf32>
    %23 = tpu.matmul %22, %16, %cst_15 {dimension_numbers = #tpu.dot_dimension_numbers<[1], [0], [0], [1], [0, 0, 1, 1], [], []>} : vector<8x32xbf16>, vector<32x32xbf16>, vector<8x32xf32> -> vector<8x32xf32>
    %24 = arith.subf %21, %23 : vector<8x32xf32>
    %25 = vector.broadcast %19 : vector<1x32xf32> to vector<8x32xf32>
    %26 = arith.addf %24, %25 : vector<8x32xf32>
    %27 = math.exp %26 : vector<8x32xf32>
    %cst_16 = arith.constant dense<0.000000e+00> : vector<8x32xf32>
    %28 = tpu.matmul %10, %14, %cst_16 {dimension_numbers = #tpu.dot_dimension_numbers<[1], [0], [0], [1], [0, 0, 1, 1], [], []>} : vector<8x32xbf16>, vector<32x32xbf16>, vector<8x32xf32> -> vector<8x32xf32>
    %29 = arith.mulf %10, %10 : vector<8x32xbf16>
    %cst_17 = arith.constant dense<0.000000e+00> : vector<8x32xf32>
    %30 = tpu.matmul %29, %16, %cst_17 {dimension_numbers = #tpu.dot_dimension_numbers<[1], [0], [0], [1], [0, 0, 1, 1], [], []>} : vector<8x32xbf16>, vector<32x32xbf16>, vector<8x32xf32> -> vector<8x32xf32>
    %31 = arith.subf %28, %30 : vector<8x32xf32>
    %32 = vector.broadcast %20 : vector<1x32xf32> to vector<8x32xf32>
    %33 = arith.addf %31, %32 : vector<8x32xf32>
    %34 = math.exp %33 : vector<8x32xf32>
    %35 = vector.extract_strided_slice %27 {offsets = [0, 0], sizes = [8, 8], strides = [1, 1]} : vector<8x32xf32> to vector<8x8xf32>
    %36 = arith.truncf %35 : vector<8x8xf32> to vector<8x8xbf16>
    %37 = vector.extract_strided_slice %34 {offsets = [0, 0], sizes = [8, 8], strides = [1, 1]} : vector<8x32xf32> to vector<8x8xf32>
    %38 = arith.truncf %37 : vector<8x8xf32> to vector<8x8xbf16>
    %cst_18 = arith.constant dense<0.000000e+00> : vector<8x8xf32>
    %39 = tpu.matmul %36, %38, %cst_18 {dimension_numbers = #tpu.dot_dimension_numbers<[1], [1], [0], [0], [0, 0, 1, 0], [], []>} : vector<8x8xbf16>, vector<8x8xbf16>, vector<8x8xf32> -> vector<8x8xf32>
    %cst_19 = arith.constant dense<0xFF800000> : vector<8xf32>
    %40 = vector.multi_reduction <maximumf>, %39, %cst_19 [1] : vector<8x8xf32> to vector<8xf32>
    %41 = vector.shape_cast %40 : vector<8xf32> to vector<8x1xf32>
    %42 = vector.broadcast %41 : vector<8x1xf32> to vector<8x8xf32>
    %43 = arith.subf %39, %42 : vector<8x8xf32>
    %44 = math.exp %43 : vector<8x8xf32>
    %cst_20 = arith.constant dense<0.000000e+00> : vector<8xf32>
    %45 = vector.multi_reduction <add>, %44, %cst_20 [1] : vector<8x8xf32> to vector<8xf32>
    %46 = vector.shape_cast %45 : vector<8xf32> to vector<8x1xf32>
    %47 = tpu.reciprocal %46 {approx = true} : vector<8x1xf32> -> vector<8x1xf32>
    %48 = vector.broadcast %47 : vector<8x1xf32> to vector<8x8xf32>
    %49 = arith.mulf %44, %48 : vector<8x8xf32>
    %50 = arith.truncf %49 : vector<8x8xf32> to vector<8x8xbf16>
    %51 = vector.extract_strided_slice %12 {offsets = [0, 0], sizes = [8, 8], strides = [1, 1]} : vector<8x32xbf16> to vector<8x8xbf16>
    %cst_21 = arith.constant dense<0.000000e+00> : vector<8x8xf32>
    %52 = tpu.matmul %50, %51, %cst_21 {dimension_numbers = #tpu.dot_dimension_numbers<[1], [0], [0], [1], [0, 0, 1, 1], [], []>} : vector<8x8xbf16>, vector<8x8xbf16>, vector<8x8xf32> -> vector<8x8xf32>
    %53 = arith.truncf %52 : vector<8x8xf32> to vector<8x8xbf16>
    %c0_22 = arith.constant 0 : index
    %c0_23 = arith.constant 0 : index
    %54 = vector.load %arg12[%c0_22, %c0_23] : memref<8x32xbf16, #tpu.memory_space<vmem>>, vector<8x8xbf16>
    tpu.vector_store %arg12[%c0_22, %c0_23], %53 {strides = array<i32>} : memref<8x32xbf16, #tpu.memory_space<vmem>>, vector<8x8xbf16>,
    %55 = vector.extract_strided_slice %27 {offsets = [0, 8], sizes = [8, 8], strides = [1, 1]} : vector<8x32xf32> to vector<8x8xf32>
    %56 = arith.truncf %55 : vector<8x8xf32> to vector<8x8xbf16>
    %57 = vector.extract_strided_slice %34 {offsets = [0, 8], sizes = [8, 8], strides = [1, 1]} : vector<8x32xf32> to vector<8x8xf32>
    %58 = arith.truncf %57 : vector<8x8xf32> to vector<8x8xbf16>
    %cst_24 = arith.constant dense<0.000000e+00> : vector<8x8xf32>
    %59 = tpu.matmul %56, %58, %cst_24 {dimension_numbers = #tpu.dot_dimension_numbers<[1], [1], [0], [0], [0, 0, 1, 0], [], []>} : vector<8x8xbf16>, vector<8x8xbf16>, vector<8x8xf32> -> vector<8x8xf32>
    %cst_25 = arith.constant dense<0xFF800000> : vector<8xf32>
    %60 = vector.multi_reduction <maximumf>, %59, %cst_25 [1] : vector<8x8xf32> to vector<8xf32>
    %61 = vector.shape_cast %60 : vector<8xf32> to vector<8x1xf32>
    %62 = vector.broadcast %61 : vector<8x1xf32> to vector<8x8xf32>
    %63 = arith.subf %59, %62 : vector<8x8xf32>
    %64 = math.exp %63 : vector<8x8xf32>
    %cst_26 = arith.constant dense<0.000000e+00> : vector<8xf32>
    %65 = vector.multi_reduction <add>, %64, %cst_26 [1] : vector<8x8xf32> to vector<8xf32>
    %66 = vector.shape_cast %65 : vector<8xf32> to vector<8x1xf32>
    %67 = tpu.reciprocal %66 {approx = true} : vector<8x1xf32> -> vector<8x1xf32>
    %68 = vector.broadcast %67 : vector<8x1xf32> to vector<8x8xf32>
    %69 = arith.mulf %64, %68 : vector<8x8xf32>
    %70 = arith.truncf %69 : vector<8x8xf32> to vector<8x8xbf16>
    %71 = vector.extract_strided_slice %12 {offsets = [0, 8], sizes = [8, 8], strides = [1, 1]} : vector<8x32xbf16> to vector<8x8xbf16>
    %cst_27 = arith.constant dense<0.000000e+00> : vector<8x8xf32>
    %72 = tpu.matmul %70, %71, %cst_27 {dimension_numbers = #tpu.dot_dimension_numbers<[1], [0], [0], [1], [0, 0, 1, 1], [], []>} : vector<8x8xbf16>, vector<8x8xbf16>, vector<8x8xf32> -> vector<8x8xf32>
    %73 = arith.truncf %72 : vector<8x8xf32> to vector<8x8xbf16>
    %c0_28 = arith.constant 0 : index
    %c8 = arith.constant 8 : index
    %74 = vector.load %arg12[%c0_28, %c8] : memref<8x32xbf16, #tpu.memory_space<vmem>>, vector<8x8xbf16>
    tpu.vector_store %arg12[%c0_28, %c8], %73 {strides = array<i32>} : memref<8x32xbf16, #tpu.memory_space<vmem>>, vector<8x8xbf16>,
    %75 = vector.extract_strided_slice %27 {offsets = [0, 16], sizes = [8, 8], strides = [1, 1]} : vector<8x32xf32> to vector<8x8xf32>
    %76 = arith.truncf %75 : vector<8x8xf32> to vector<8x8xbf16>
    %77 = vector.extract_strided_slice %34 {offsets = [0, 16], sizes = [8, 8], strides = [1, 1]} : vector<8x32xf32> to vector<8x8xf32>
    %78 = arith.truncf %77 : vector<8x8xf32> to vector<8x8xbf16>
    %cst_29 = arith.constant dense<0.000000e+00> : vector<8x8xf32>
    %79 = tpu.matmul %76, %78, %cst_29 {dimension_numbers = #tpu.dot_dimension_numbers<[1], [1], [0], [0], [0, 0, 1, 0], [], []>} : vector<8x8xbf16>, vector<8x8xbf16>, vector<8x8xf32> -> vector<8x8xf32>
    %cst_30 = arith.constant dense<0xFF800000> : vector<8xf32>
    %80 = vector.multi_reduction <maximumf>, %79, %cst_30 [1] : vector<8x8xf32> to vector<8xf32>
    %81 = vector.shape_cast %80 : vector<8xf32> to vector<8x1xf32>
    %82 = vector.broadcast %81 : vector<8x1xf32> to vector<8x8xf32>
    %83 = arith.subf %79, %82 : vector<8x8xf32>
    %84 = math.exp %83 : vector<8x8xf32>
    %cst_31 = arith.constant dense<0.000000e+00> : vector<8xf32>
    %85 = vector.multi_reduction <add>, %84, %cst_31 [1] : vector<8x8xf32> to vector<8xf32>
    %86 = vector.shape_cast %85 : vector<8xf32> to vector<8x1xf32>
    %87 = tpu.reciprocal %86 {approx = true} : vector<8x1xf32> -> vector<8x1xf32>
    %88 = vector.broadcast %87 : vector<8x1xf32> to vector<8x8xf32>
    %89 = arith.mulf %84, %88 : vector<8x8xf32>
    %90 = arith.truncf %89 : vector<8x8xf32> to vector<8x8xbf16>
    %91 = vector.extract_strided_slice %12 {offsets = [0, 16], sizes = [8, 8], strides = [1, 1]} : vector<8x32xbf16> to vector<8x8xbf16>
    %cst_32 = arith.constant dense<0.000000e+00> : vector<8x8xf32>
    %92 = tpu.matmul %90, %91, %cst_32 {dimension_numbers = #tpu.dot_dimension_numbers<[1], [0], [0], [1], [0, 0, 1, 1], [], []>} : vector<8x8xbf16>, vector<8x8xbf16>, vector<8x8xf32> -> vector<8x8xf32>
    %93 = arith.truncf %92 : vector<8x8xf32> to vector<8x8xbf16>
    %c0_33 = arith.constant 0 : index
    %c16 = arith.constant 16 : index
    %94 = vector.load %arg12[%c0_33, %c16] : memref<8x32xbf16, #tpu.memory_space<vmem>>, vector<8x8xbf16>
    tpu.vector_store %arg12[%c0_33, %c16], %93 {strides = array<i32>} : memref<8x32xbf16, #tpu.memory_space<vmem>>, vector<8x8xbf16>,
    %95 = vector.extract_strided_slice %27 {offsets = [0, 24], sizes = [8, 8], strides = [1, 1]} : vector<8x32xf32> to vector<8x8xf32>
    %96 = arith.truncf %95 : vector<8x8xf32> to vector<8x8xbf16>
    %97 = vector.extract_strided_slice %34 {offsets = [0, 24], sizes = [8, 8], strides = [1, 1]} : vector<8x32xf32> to vector<8x8xf32>
    %98 = arith.truncf %97 : vector<8x8xf32> to vector<8x8xbf16>
    %cst_34 = arith.constant dense<0.000000e+00> : vector<8x8xf32>
    %99 = tpu.matmul %96, %98, %cst_34 {dimension_numbers = #tpu.dot_dimension_numbers<[1], [1], [0], [0], [0, 0, 1, 0], [], []>} : vector<8x8xbf16>, vector<8x8xbf16>, vector<8x8xf32> -> vector<8x8xf32>
    %cst_35 = arith.constant dense<0xFF800000> : vector<8xf32>
    %100 = vector.multi_reduction <maximumf>, %99, %cst_35 [1] : vector<8x8xf32> to vector<8xf32>
    %101 = vector.shape_cast %100 : vector<8xf32> to vector<8x1xf32>
    %102 = vector.broadcast %101 : vector<8x1xf32> to vector<8x8xf32>
    %103 = arith.subf %99, %102 : vector<8x8xf32>
    %104 = math.exp %103 : vector<8x8xf32>
    %cst_36 = arith.constant dense<0.000000e+00> : vector<8xf32>
    %105 = vector.multi_reduction <add>, %104, %cst_36 [1] : vector<8x8xf32> to vector<8xf32>
    %106 = vector.shape_cast %105 : vector<8xf32> to vector<8x1xf32>
    %107 = tpu.reciprocal %106 {approx = true} : vector<8x1xf32> -> vector<8x1xf32>
    %108 = vector.broadcast %107 : vector<8x1xf32> to vector<8x8xf32>
    %109 = arith.mulf %104, %108 : vector<8x8xf32>
    %110 = arith.truncf %109 : vector<8x8xf32> to vector<8x8xbf16>
    %111 = vector.extract_strided_slice %12 {offsets = [0, 24], sizes = [8, 8], strides = [1, 1]} : vector<8x32xbf16> to vector<8x8xbf16>
    %cst_37 = arith.constant dense<0.000000e+00> : vector<8x8xf32>
    %112 = tpu.matmul %110, %111, %cst_37 {dimension_numbers = #tpu.dot_dimension_numbers<[1], [0], [0], [1], [0, 0, 1, 1], [], []>} : vector<8x8xbf16>, vector<8x8xbf16>, vector<8x8xf32> -> vector<8x8xf32>
    %113 = arith.truncf %112 : vector<8x8xf32> to vector<8x8xbf16>
    %c0_38 = arith.constant 0 : index
    %c24 = arith.constant 24 : index
    %114 = vector.load %arg12[%c0_38, %c24] : memref<8x32xbf16, #tpu.memory_space<vmem>>, vector<8x8xbf16>
    tpu.vector_store %arg12[%c0_38, %c24], %113 {strides = array<i32>} : memref<8x32xbf16, #tpu.memory_space<vmem>>, vector<8x8xbf16>,
    %c0_39 = arith.constant 0 : index
    %c0_40 = arith.constant 0 : index
    %c0_41 = arith.constant 0 : index
    %115 = vector.load %arg10[%c0_39, %c0_40, %c0_41] : memref<1x8x32xf32, #tpu.memory_space<vmem>>, vector<1x8x32xf32>
    %116 = vector.shape_cast %115 : vector<1x8x32xf32> to vector<8x32xf32>
    %c0_42 = arith.constant 0 : index
    %c0_43 = arith.constant 0 : index
    %117 = vector.load %arg12[%c0_42, %c0_43] : memref<8x32xbf16, #tpu.memory_space<vmem>>, vector<8x32xbf16>
    %c0_44 = arith.constant 0 : index
    %c0_45 = arith.constant 0 : index
    %c0_46 = arith.constant 0 : index
    %118 = vector.load %arg6[%c0_44, %c0_45, %c0_46] : memref<1x32x32xbf16, #tpu.memory_space<vmem>>, vector<1x32x32xbf16>
    %119 = vector.shape_cast %118 : vector<1x32x32xbf16> to vector<32x32xbf16>
    %cst_47 = arith.constant dense<0.000000e+00> : vector<8x32xf32>
    %120 = tpu.matmul %117, %119, %cst_47 {dimension_numbers = #tpu.dot_dimension_numbers<[1], [0], [0], [1], [0, 0, 1, 1], [], []>} : vector<8x32xbf16>, vector<32x32xbf16>, vector<8x32xf32> -> vector<8x32xf32>
    %121 = arith.addf %116, %120 : vector<8x32xf32>
    %c0_48 = arith.constant 0 : index
    %c0_49 = arith.constant 0 : index
    %c0_50 = arith.constant 0 : index
    %122 = vector.load %arg10[%c0_48, %c0_49, %c0_50] : memref<1x8x32xf32, #tpu.memory_space<vmem>>, vector<1x8x32xf32>
    %123 = vector.shape_cast %122 : vector<1x8x32xf32> to vector<8x32xf32>
    %124 = vector.shape_cast %121 : vector<8x32xf32> to vector<1x8x32xf32>
    tpu.vector_store %arg10[%c0_48, %c0_49, %c0_50], %124 {strides = array<i32>} : memref<1x8x32xf32, #tpu.memory_space<vmem>>, vector<1x8x32xf32>,
    return
  }
  func.func @transform_0(%arg0: i32, %arg1: i32) -> (i32, i32, i32) {
    %c0_i32 = arith.constant 0 : i32
    %c0_i32_0 = arith.constant 0 : i32
    %c0_i32_1 = arith.constant 0 : i32
    return %arg0, %c0_i32, %c0_i32_0 : i32, i32, i32
  }
  func.func @transform_1(%arg0: i32, %arg1: i32) -> (i32, i32) {
    %c0_i32 = arith.constant 0 : i32
    %c0_i32_0 = arith.constant 0 : i32
    %c0_i32_1 = arith.constant 0 : i32
    return %c0_i32, %c0_i32_0 : i32, i32
  }
  func.func @transform_2(%arg0: i32, %arg1: i32) -> (i32, i32) {
    %c0_i32 = arith.constant 0 : i32
    %c0_i32_0 = arith.constant 0 : i32
    %c0_i32_1 = arith.constant 0 : i32
    return %c0_i32, %c0_i32_0 : i32, i32
  }
  func.func @transform_3(%arg0: i32, %arg1: i32) -> (i32, i32, i32) {
    %c0_i32 = arith.constant 0 : i32
    %c0_i32_0 = arith.constant 0 : i32
    %c0_i32_1 = arith.constant 0 : i32
    return %arg1, %c0_i32, %c0_i32_0 : i32, i32, i32
  }
  func.func @transform_4(%arg0: i32, %arg1: i32) -> (i32, i32, i32) {
    %c0_i32 = arith.constant 0 : i32
    %c0_i32_0 = arith.constant 0 : i32
    %c0_i32_1 = arith.constant 0 : i32
    return %arg1, %c0_i32, %c0_i32_0 : i32, i32, i32
  }
  func.func @transform_5(%arg0: i32, %arg1: i32) -> (i32, i32, i32) {
    %c0_i32 = arith.constant 0 : i32
    %c0_i32_0 = arith.constant 0 : i32
    %c0_i32_1 = arith.constant 0 : i32
    return %arg1, %c0_i32, %c0_i32_0 : i32, i32, i32
  }
  func.func @transform_6(%arg0: i32, %arg1: i32) -> (i32, i32, i32) {
    %c0_i32 = arith.constant 0 : i32
    %c0_i32_0 = arith.constant 0 : i32
    %c0_i32_1 = arith.constant 0 : i32
    return %arg1, %c0_i32, %c0_i32_0 : i32, i32, i32
  }
  func.func @transform_7(%arg0: i32, %arg1: i32) -> (i32, i32, i32) {
    %c0_i32 = arith.constant 0 : i32
    %c0_i32_0 = arith.constant 0 : i32
    %c0_i32_1 = arith.constant 0 : i32
    return %arg1, %c0_i32, %c0_i32_0 : i32, i32, i32
  }
  func.func @transform_8(%arg0: i32, %arg1: i32) -> (i32, i32, i32) {
    %c0_i32 = arith.constant 0 : i32
    %c0_i32_0 = arith.constant 0 : i32
    %c0_i32_1 = arith.constant 0 : i32
    return %arg0, %c0_i32, %c0_i32_0 : i32, i32, i32
  }
}

</mosaic_0001>

<bundles_post_ra>
// kernel: tpu_custom_call.1
= control target key start
LH: loop header
LB: loop body
LE: loop exit
PB: predicated region body
PF: predicated region fallthrough
CT: control target
= control target key end

     0   :  { %s2610_s0 = inlined_call_operand.hbm [shape: f32[2,8,32], index: 0, kind: input, shape index: {}]   ;;  %s2611_s1 = inlined_call_operand.hbm [shape: f32[1,32], index: 1, kind: input, shape index: {}]   ;;  %s2612_s2 = inlined_call_operand.hbm [shape: f32[1,32], index: 2, kind: input, shape index: {}]   ;;  %s2613_s3 = inlined_call_operand.hbm [shape: bf16[1,32,96], index: 3, kind: input, shape index: {}]   ;;  %s2614_s4 = inlined_call_operand.hbm [shape: bf16[1,32,32], index: 4, kind: input, shape index: {}]   ;;  %s2615_s5 = inlined_call_operand.vmem [shape: bf16[1,32,32], index: 5, kind: input, shape index: {}]   ;;  %s2616_s6 = inlined_call_operand.hbm [shape: bf16[1,32,32], index: 6, kind: input, shape index: {}]   ;;  %s2617_s7 = inlined_call_operand.vmem [shape: f32[1,2,32], index: 7, kind: input, shape index: {}]   ;;  %s2618_s8 = inlined_call_operand.hbm [shape: f32[2,8,32], index: 8, kind: output, shape index: {}]  }
   0x1   :  { %2628 = sst [smem:[#allocation21_spill]] %s2611_s1 }
   0x2   :  { %2629 = sst [smem:[#allocation22_spill]] %s2612_s2 }
   0x3   :  { %2630 = sst [smem:[#allocation23_spill]] %s2613_s3 }
   0x4   :  { %13 = vsyncpa [#allocation5], 0 }
   0x5   :  { %15 = vsyncpa [#allocation5 + $0x1], 0 }
   0x6   :  { %16 = vsyncpa [#allocation8], 0 }
   0x7   :  { %17 = vsyncpa [#allocation11], 0 }
   0x8   :  { %18 = vsyncpa [#allocation14], 0 }
   0x9   :  { %19 = vsyncpa [#allocation6], 0 }
   0xa   :  { %21 = vsyncpa [#allocation6 + $0x1], 0  ;;  %s2181_s27 = smov 0   ;;  %s2183_s28 = smov 0  }
   0xb   :  { %s2185_s29 = smov 0   ;;  %s2187_s30 = smov 0  }
   0xc   :  { %s2189_s9 = smov 0   ;;  %s2191_s10 = smov 0  }
   0xd LB: > { %s2622_s11 = sadd.s32 4294967295, %s2112_s10   ;;  %p1507_p0 = scmp.ge.s32.totalorder %s2112_s10, 1  ;;  %s2112_s10 = sphi %s2191_s10, %s27_s10   ;;  %s2108_s9 = sphi %s2189_s9, %s2656_s9   ;;  %s2104_s30 = sphi %s2187_s30, %s2655_s30   ;;  %s2100_s29 = sphi %s2185_s29, %s2654_s29   ;;  %s2096_s28 = sphi %s2183_s28, %s2653_s28   ;;  %s2092_s27 = sphi %s2181_s27, %s2652_s27  }
   0xe   : > { %p2215_p1 = scmp.eq.s32.totalorder %s2622_s11, 0  ;;  %p268_p2 = scmp.lt.s32.totalorder %s2112_s10, 3 }
   0xf   : > { %s2114_s14 = smov [#allocation7]   ;;  %s2115_s16 = smov [#allocation10]  }
  0x10   : > { %s2631_s12 = scalar_select %p2215_p1, 1, 0 }
  0x11   : > { %p2220_p3 = pnand %p1507_p0, %p268_p2  ;;  %s281_s15 = sshll.u32 %s2114_s14, 4  ;;  %s282_s15 = int_to_ptr.vmem [resolvable:$true] %s281_s15 }
  0x12   : > { %s305_s17 = sshll.u32 %s2115_s16, 4  ;;  %s2116_s19 = smov [#allocation9]   ;;  %s2233_s17 = int_to_ptr.vmem [resolvable:$true] %s305_s17 }
  0x13   : > { %s2632_s13 = scalar_select %p2220_p3, 1, 0 }
  0x14   : > { %p1714_p5 = pneg %p2220_p3  ;;  %s2235_s20 = sshll.u32 %s2116_s19, 4  ;;  %s293_s20 = int_to_ptr.vmem [resolvable:$true] %s2235_s20 }
  0x15   : > { %s2634_s1 = sld [smem:[#allocation21_spill]] }
  0x16   : > { %p2229_p6 = pnand %p1714_p5, %p2215_p1 }
  0x18   : > { %p2245_p8 = pneg %p2229_p6 }
  0x1b   : > { %s1848_s23 = scalar_lea.hbm %s2634_s1, 16 }
  0x1c   : > { %p1849_p7 = scmp.ne.s32.totalorder %s2634_s1, %s1848_s23  ;;  %p1855_p11 = scmp.lt.u32.totalorder %s1848_s23, %s2634_s1 }
  0x1e   : > { %p1851_p9 = pnand %p2245_p8, %p1849_p7 }
  0x20   : > { %p1852_p10 = pneg %p1851_p9 }
  0x22   : > { %p1857_p12 = pnand %p1855_p11, %p1852_p10 }
  0x24   : > { %1860 = shalt.err (!%p1857_p12)
}
  0x25   : > { %s1861_s19 = scalar_lea.vmem %s282_s15, 16  ;;  %s1868_s21 = scalar_lea.vmem %s282_s15, 32 }
  0x26   : > { %p1862_p13 = scmp.ne.s32.totalorder %s282_s15, %s1861_s19  ;;  %p1869_p5 = scmp.lt.s32.totalorder %s282_s15, %s282_s15 }
  0x27   : > { %p1870_p4 = scmp.lt.s32.totalorder %s1868_s21, %s1861_s19 }
  0x28   : > { %p1864_p0 = pnand %p1862_p13, %p2245_p8 }
  0x29   : > { %p1871_p3 = por %p1870_p4, %p1869_p5 }
  0x2a   : > { %p1865_p2 = pneg %p1864_p0 }
  0x2c   : > { %p1872_p1 = pnand %p1871_p3, %p1865_p2 }
  0x2e   : > { %1875 = shalt.err (!%p1872_p1)
}
  0x2f   : > { %1717 = dma.hbm_to_vmem [thread:$0]  (!%p2229_p6), %s2634_s1, 16, %s282_s15, [#allocation8]  }
  0x30   : > { %s2636_s3 = sld [smem:[#allocation23_spill]] }
  0x36   : > { %s1876_s14 = scalar_lea.hbm %s2636_s3, 256 }
  0x37   : > { %p1877_p7 = scmp.ne.s32.totalorder %s2636_s3, %s1876_s14  ;;  %p1883_p1 = scmp.lt.u32.totalorder %s1876_s14, %s2636_s3 }
  0x39   : > { %p1879_p9 = pnand %p1877_p7, %p2245_p8 }
  0x3b   : > { %p1880_p4 = pneg %p1879_p9 }
  0x3d   : > { %p1885_p3 = pnand %p1883_p1, %p1880_p4 }
  0x3f   : > { %1888 = shalt.err (!%p1885_p3)
}
  0x40   : > { %s1889_s15 = scalar_lea.vmem %s2233_s17, 256  ;;  %p1897_p13 = scmp.lt.s32.totalorder %s2233_s17, %s2233_s17 }
  0x41   : > { %p1890_p10 = scmp.ne.s32.totalorder %s2233_s17, %s1889_s15  ;;  %p1898_p0 = scmp.lt.s32.totalorder %s1889_s15, %s1889_s15 }
  0x43   : > { %p1892_p11 = pnand %p1890_p10, %p2245_p8  ;;  %p1899_p2 = por %p1898_p0, %p1897_p13 }
  0x45   : > { %p1893_p12 = pneg %p1892_p11 }
  0x47   : > { %p1900_p5 = pnand %p1899_p2, %p1893_p12 }
  0x49   : > { %1903 = shalt.err (!%p1900_p5)
}
  0x4a   : > { %s2623_s11 = smov 64   ;;  %s2625_s22 = smov 4  }
  0x4b   : > { %1723 = dma.hbm_to_vmem [thread:$0]  (!%p2229_p6), %s2636_s3, 256, %s2233_s17, [#allocation11], %s2623_s11, %s2623_s11, %s2625_s22  }
  0x4c   : > { %s2637_s2 = sld [smem:[#allocation22_spill]] }
  0x52   : > { %s1904_s16 = scalar_lea.hbm %s2637_s2, 16 }
  0x53   : > { %p1905_p7 = scmp.ne.s32.totalorder %s2637_s2, %s1904_s16  ;;  %p1911_p1 = scmp.lt.u32.totalorder %s1904_s16, %s2637_s2 }
  0x55   : > { %p1907_p9 = pnand %p1905_p7, %p2245_p8 }
  0x57   : > { %p1908_p4 = pneg %p1907_p9 }
  0x59   : > { %p1913_p3 = pnand %p1911_p1, %p1908_p4 }
  0x5b   : > { %1916 = shalt.err (!%p1913_p3)
}
  0x5c   : > { %s1917_s24 = scalar_lea.vmem %s293_s20, 16  ;;  %s1924_s17 = scalar_lea.vmem %s293_s20, 32 }
  0x5d   : > { %p1918_p10 = scmp.ne.s32.totalorder %s293_s20, %s1917_s24  ;;  %p1925_p13 = scmp.lt.s32.totalorder %s293_s20, %s293_s20 }
  0x5e   : > { %p1926_p0 = scmp.lt.s32.totalorder %s1924_s17, %s1917_s24 }
  0x5f   : > { %p1920_p11 = pnand %p1918_p10, %p2245_p8 }
  0x60   : > { %p1927_p2 = por %p1926_p0, %p1925_p13 }
  0x61   : > { %p1921_p12 = pneg %p1920_p11 }
  0x63   : > { %p1928_p5 = pnand %p1927_p2, %p1921_p12 }
  0x65   : > { %1931 = shalt.err (!%p1928_p5)
}
  0x66   : > { %1720 = dma.hbm_to_vmem [thread:$0]  (!%p2229_p6), %s2637_s2, 16, %s293_s20, [#allocation8]  }
  0x67   : > { %s2119_s1 = smov [#allocation12]   ;;  %s2120_s16 = smov [#allocation13]  }
  0x68   : > { %s321_s14 = sshll.u32 %s2119_s1, 4  ;;  %s345_s19 = sshll.u32 %s2120_s16, 4  ;;  %s322_s14 = int_to_ptr.vmem [resolvable:$true] %s321_s14  ;;  %s346_s19 = int_to_ptr.vmem [resolvable:$true] %s345_s19 }
  0x69   : > { %s1932_s11 = scalar_lea.hbm %s2614_s4, 256 }
  0x6a   : > { %p1933_p7 = scmp.ne.s32.totalorder %s2614_s4, %s1932_s11  ;;  %p1939_p1 = scmp.lt.u32.totalorder %s1932_s11, %s2614_s4 }
  0x6c   : > { %p1935_p9 = pnand %p1933_p7, %p2245_p8 }
  0x6e   : > { %p1936_p4 = pneg %p1935_p9 }
  0x70   : > { %p1941_p3 = pnand %p1939_p1, %p1936_p4 }
  0x72   : > { %1944 = shalt.err (!%p1941_p3)
}
  0x73   : > { %s1945_s20 = scalar_lea.vmem %s322_s14, 256  ;;  %p1953_p13 = scmp.lt.s32.totalorder %s322_s14, %s322_s14 }
  0x74   : > { %p1946_p10 = scmp.ne.s32.totalorder %s322_s14, %s1945_s20  ;;  %p1954_p0 = scmp.lt.s32.totalorder %s1945_s20, %s1945_s20 }
  0x76   : > { %p1948_p11 = pnand %p1946_p10, %p2245_p8  ;;  %p1955_p2 = por %p1954_p0, %p1953_p13 }
  0x78   : > { %p1949_p12 = pneg %p1948_p11 }
  0x7a   : > { %p1956_p5 = pnand %p1955_p2, %p1949_p12 }
  0x7c   : > { %1959 = shalt.err (!%p1956_p5)
}
  0x7d   : > { %s2638_s25 = smov 4   ;;  %s2639_s1 = smov 64  }
  0x7e   : > { %1726 = dma.hbm_to_vmem [thread:$0]  (!%p2229_p6), %s2614_s4, 256, %s322_s14, [#allocation11], %s2639_s1, %s2639_s1, %s2638_s25  }
  0x7f   : > { %s1960_s15 = scalar_lea.hbm %s2616_s6, 256 }
  0x80   : > { %p1961_p7 = scmp.ne.s32.totalorder %s2616_s6, %s1960_s15  ;;  %p1967_p1 = scmp.lt.u32.totalorder %s1960_s15, %s2616_s6 }
  0x82   : > { %p1963_p9 = pnand %p1961_p7, %p2245_p8 }
  0x84   : > { %p1964_p4 = pneg %p1963_p9 }
  0x86   : > { %p1969_p3 = pnand %p1967_p1, %p1964_p4 }
  0x88   : > { %1972 = shalt.err (!%p1969_p3)
}
  0x89   : > { %s1973_s22 = scalar_lea.vmem %s346_s19, 256  ;;  %p1981_p13 = scmp.lt.s32.totalorder %s346_s19, %s346_s19 }
  0x8a   : > { %p1974_p10 = scmp.ne.s32.totalorder %s346_s19, %s1973_s22  ;;  %p1982_p0 = scmp.lt.s32.totalorder %s1973_s22, %s1973_s22 }
  0x8c   : > { %p1976_p11 = pnand %p1974_p10, %p2245_p8  ;;  %p1983_p2 = por %p1982_p0, %p1981_p13 }
  0x8e   : > { %p1977_p12 = pneg %p1976_p11 }
  0x90   : > { %p1984_p5 = pnand %p1983_p2, %p1977_p12 }
  0x92   : > { %1987 = shalt.err (!%p1984_p5)
}
  0x93   : > { %1729 = dma.hbm_to_vmem [thread:$0]  (!%p2229_p6), %s2616_s6, 256, %s346_s19, [#allocation14], %s2639_s1, %s2639_s1, %s2638_s25  }
  0x94   : > { %s1506_s18 = sadd.s32 4294967294, %s2112_s10   ;;  %s39_s26 = sadd.s32 1, %s2108_s9 }
  0x95   : > { %s46_s16 = sadd.s32 1, %s2100_s29  ;;  %p41_p8 = scmp.ge.s32.totalorder %s39_s26, 2 }
  0x96   : > { %p53_p7 = scmp.ne.s32.totalorder %s2100_s29, %s2096_s28  ;;  %p54_p9 = scmp.eq.s32.totalorder %s2112_s10, 0 }
  0x97   : > { %p59_p4 = scmp.ne.s32.totalorder %s2096_s28, %s2092_s27  ;;  %s2658_s26 = smov (%p41_p8, %s39_s26), 0 }
  0x98   : > { %p2358_p1 = por %p54_p9, %p53_p7  ;;  %p2641_p3 = scmp.ne.s32.totalorder %s2631_s12, 0 }
  0x99   : > { %s43_s25 = ssub.s32 %s2108_s9, %s2658_s26  ;;  %s2643_s1 = sadd.s32 4294967295, %s2112_s10  }
  0x9a   : > { %p2364_p6 = por %p2641_p3, %p59_p4  ;;  %p255_p10 = scmp.eq.s32.totalorder %s2643_s1, 1 }
  0x9b   : > { %p44_p11 = scmp.eq.s32.totalorder %s43_s25, 0  ;;  %p261_p12 = scmp.eq.s32.totalorder %s1506_s18, 1 }
  0x9c   : > { %p2372_p13 = por %p255_p10, %p53_p7  ;;  %p1743_p0 = scmp.lt.s32.totalorder %s2112_s10, 2 }
  0x9d   : > { %s2378_s24 = scalar_select %p44_p11, %s2100_s29, %s46_s16  }
  0x9e   : > { %s2644_s15 = scalar_select %p2372_p13, 1, 0 }
  0x9f   : > { %p2380_p2 = por %p261_p12, %p59_p4  ;;  %s366_s23 = sand.u32 1, %s2100_s29  }
  0xa0   : > { %s1516_s20 = sshll.u32 %s366_s23, 3  ;;  %s1517_s22 = sshll.u32 %s2108_s9, 7 }
  0xa1   : > { %s2645_s17 = scalar_select %p2380_p2, 1, 0 }
  0xa2   : > { %s2389_s1 = scalar_lea.hbm %s2610_s0, %s1517_s22  ;;  %s370_s18 = scalar_lea.vmem [#allocation4], %s1516_s20 }
  0xa3   : > { %s377_s25 = sshll.u32 %s370_s18, 4  ;;  %p2395_p5 = pnand %p1743_p0, %p2358_p1  ;;  %s2391_s25 = int_to_ptr.vmem [resolvable:$true] %s377_s25 }
  0xa4   : > { %s367_s2 = scalar_lea.sflag [#allocation5], %s366_s23  ;;  %s1988_s3 = scalar_lea.hbm %s2389_s1, 128 }
  0xa5   : > { %p1989_p8 = scmp.ne.s32.totalorder %s2389_s1, %s1988_s3  ;;  %p1990_p7 = pneg %p2395_p5 }
  0xa6   : > { %s1993_s14 = scalar_lea.hbm %s2610_s0, 256  ;;  %p1994_p1 = scmp.lt.u32.totalorder %s2389_s1, %s2610_s0 }
  0xa7   : > { %p1991_p9 = pnand %p1990_p7, %p1989_p8  ;;  %p1995_p3 = scmp.lt.u32.totalorder %s1993_s14, %s1988_s3 }
  0xa8   : > { %p1997_p11 = scmp.lt.u32.totalorder %s1988_s3, %s2389_s1 }
  0xa9   : > { %p1992_p4 = pneg %p1991_p9  ;;  %p1996_p10 = por %p1995_p3, %p1994_p1 }
  0xab   : > { %p1998_p12 = por %p1997_p11, %p1996_p10 }
  0xad   : > { %p1999_p0 = pnand %p1998_p12, %p1992_p4 }
  0xaf   : > { %2002 = shalt.err (!%p1999_p0)
}
  0xb0   : > { %s2003_s23 = scalar_lea.vmem %s2391_s25, 128  ;;  %s2121_s18 = smov [#allocation4]  }
  0xb1   : > { %p2004_p8 = scmp.ne.s32.totalorder %s2391_s25, %s2003_s23  ;;  %s2008_s20 = sshll.u32 %s2121_s18, 4  ;;  %s2009_s20 = int_to_ptr.vmem [resolvable:$false] %s2008_s20 }
  0xb2   : > { %s2010_s22 = scalar_lea.vmem %s2009_s20, 256  ;;  %p2011_p13 = scmp.lt.s32.totalorder %s2391_s25, %s2009_s20 }
  0xb3   : > { %p2006_p9 = pnand %p2004_p8, %p1990_p7  ;;  %p2012_p1 = scmp.lt.s32.totalorder %s2010_s22, %s2003_s23 }
  0xb5   : > { %p2007_p2 = pneg %p2006_p9  ;;  %p2013_p3 = por %p2012_p1, %p2011_p13 }
  0xb7   : > { %p2014_p10 = pnand %p2013_p3, %p2007_p2 }
  0xb9   : > { %2017 = shalt.err (!%p2014_p10)
}
  0xba   : > { %1733 = dma.hbm_to_vmem [thread:$0]  (!%p2395_p5), %s2389_s1, 128, %s2391_s25, %s367_s2  }
  0xbb   : > { %p2647_p4 = scmp.ne.s32.totalorder %s2632_s13, 0 }
  0xbc   : > { %s2427_s3 = sand.u32 (!%p2647_p4), 1, %s2096_s28  }
  0xbd   : > { %386 = sbr.rel (%p2647_p4) target bundleno = 2362 (0x93a), region = 52  ;;  %s1519_s14 = sshll.u32 (!%p2647_p4), %s2427_s3, 3 }
  0xbe   : > { %s389_s21 = scalar_lea.sflag (!%p2647_p4), [#allocation5], %s2427_s3  ;;  %s392_s11 = scalar_lea.vmem (!%p2647_p4), [#allocation4], %s1519_s14 }
  0xc4   : > { %2071 = dma.done.wait (%p2364_p6), %s389_s21, 128  }
  0xc5   : > { %2073 = vsyncadd (%p2364_p6), %s389_s21, 4294967168  ;;  %p2648_p13 = scmp.ne.s32.totalorder %s2631_s12, 0 }
  0xc7   : > { %2075 = dma.done.wait (%p2648_p13), [#allocation8], 32  }
  0xc8   : > { %2077 = vsyncadd (%p2648_p13), [#allocation8], 4294967264 }
  0xc9   : > { %2079 = dma.done.wait (%p2648_p13), [#allocation11], 512  }
  0xca   : > { %2081 = vsyncadd (%p2648_p13), [#allocation11], 4294966784 }
  0xcb   : > { %2083 = dma.done.wait (%p2648_p13), [#allocation14], 256  }
  0xcc   : > { %2085 = vsyncadd (%p2648_p13), [#allocation14], 4294967040  ;;  %vm469_vm0 = vcmask 261120   ;;  %v2449_v0 = vld [vmem:[%s392_s11] sm:$0xff]  ;;  %v1818_v7 = vld [vmem:[#allocation10] sm:$0xff]   ;;  %v2122_v8 = vmov 0.0   ;;  %v687_v33 = vlaneseq }
  0xcd   : > { %v470_v1 = vsel %vm469_vm0, %v2449_v0, 0.0  ;;  %1594 = vmatprep.subr.bf16.mxu0 %v2122_v8  ;;  %1602 = vmatprep.subr.bf16.mxu1 %v2122_v8  ;;  %v1819_v9 = vld [vmem:[#allocation10 + $0x8] sm:$0xff]   ;;  %vm2123_vm1 = vmmov 0   ;;  %v1526_v15 = vld [vmem:[#allocation7] ss:$0 sm:$0xff]  ;;  %vm501_vm2 = vcmask 257024  }
  0xce   : > { %471 = vadd.xlane.f32.xlu0 %v470_v1  ;;  %1595 = vmatpush3.bf16.msra.mxu0 %v1818_v7  ;;  %v1820_v10 = vld [vmem:[%s2615_s5] sm:$0xff]   ;;  %v1527_v17 = vld [vmem:[#allocation9] ss:$0 sm:$0xff]  ;;  %v1822_v23 = vld [vmem:[%s2615_s5 + $0x8] sm:$0xff]   ;;  %s2124_s1 = smov 96   ;;  %v688_v34 = vshrl.u32 %v687_v33, 7 }
  0xcf   : > { %1598 = vmatprep.mubr.msk.bf16.mxu0 %vm2123_vm1, %v2122_v8  ;;  %1596 = vmatprep.subr.bf16.mxu0 %v2122_v8  ;;  %v1821_v21 = vld [vmem:[#allocation13] sm:$0xff]   ;;  %v1823_v24 = vld [vmem:[#allocation13 + $0x8] sm:$0xff]   ;;  %s2125_s23 = smov 120   ;;  %vm796_vm3 = vcmask 64512   ;;  %s2126_s18 = smov 112   ;;  %vm860_vm4 = vcmask 1043456  }
  0xd0   : > { %1606 = vmatprep.mubr.msk.bf16.mxu1 %vm2123_vm1, %v2122_v8  ;;  %1603 = vmatpush3.bf16.msra.mxu1 %v1820_v10  ;;  %v689_v35 = vsub.s32 0, %v688_v34  ;;  %v574_v36 = vld [vmem:[%s2617_s7] sm:$0x3]  ;;  %v789_v51 = vsub.s32 1, %v688_v34  ;;  %s2127_s20 = smov 104   ;;  %s2128_s22 = smov 56  }
  0xd1   : > { %1604 = vmatprep.subr.bf16.mxu1 %v2122_v8  ;;  %s2129_s21 = smov 64   ;;  %s2130_s11 = smov 40   ;;  %vm905_vm5 = vcmask 60416   ;;  %vm1026_vm6 = vcmask 126016   ;;  %vm1145_vm7 = vcmask 191616   ;;  %vm1264_vm8 = vcmask 257216  }
  0xd2   : > { %1597 = vmatpush3.bf16.msra.mxu0 %v1819_v9  ;;  %v690_v39 = vrot.slane %v574_v36, %v689_v35  ;;  %v790_v56 = vrot.slane %v574_v36, %v789_v51  ;;  %s2131_s2 = smov 48   ;;  %s2132_s12 = smov 8  }
  0xd3   : > { %1610 = vmatprep.subr.bf16.mxu0 %v2122_v8  ;;  %s2133_s13 = smov 16   ;;  %s453_s19 = scalar_lea.vmem [#allocation15], %s1519_s14 }
  0xd4   : > { %1605 = vmatpush3.bf16.msra.mxu1 %v1822_v23  ;;  %503 = vst.msk [vmem:[%s453_s19] sm:$0xff] %vm469_vm0, %v2449_v0  ;;  %s1554_s14 = sshll.u32 %s2104_s30, 7  ;;  %s1343_s25 = sshll.u32 %s453_s19, 4  ;;  %s2562_s25 = int_to_ptr.vmem [resolvable:$true] %s1343_s25 }
  0xd5   : > { %1618 = vmatprep.subr.bf16.mxu1 %v2122_v8  ;;  %s2018_s30 = scalar_lea.vmem %s2562_s25, 128  ;;  %p2649_p2 = scmp.ne.s32.totalorder %s2644_s15, 0 }
  0xd6   : > { %p2019_p6 = scmp.ne.s32.totalorder %s2562_s25, %s2018_s30 }
  0xd8   : > { %p2020_p5 = pnand %p2019_p6, %p2649_p2 }
  0xda   : > { %p2021_p7 = pneg %p2020_p5 }
 0x15b   : > { %v472_v2 = vpop.xlane.xlu0 %471 }
 0x15c   : > { %v474_v3 = vmul.f32 0.03125, %v472_v2 }
 0x15e   : > { %v475_v4 = vsub.f32 %v2449_v0, %v474_v3  ;;  %v1266_v0 = vld [vmem:[%s453_s19] sm:$0xff] }
 0x160   : > { %v476_v5 = vmul.f32 %v475_v4, %v475_v4 }
 0x162   : > { %v477_v6 = vsel %vm469_vm0, %v476_v5, 0.0 }
 0x163   : > { %478 = vadd.xlane.f32.xlu0 %v477_v6 }
 0x1f0   : > { %v479_v11 = vpop.xlane.xlu0 %478 }
 0x1f1   : > { %v480_v12 = vmul.f32 0.03125, %v479_v11 }
 0x1f3   : > { %v481_v13 = vadd.f32 1e-05, %v480_v12 }
 0x1f5   : > { %1826 = vrsqrt.f32 %v481_v13 }
 0x1ff   : > { %v1827_v14 = vpop.eup %1826 }
 0x200   : > { %v483_v16 = vmul.f32 %v1827_v14, %v475_v4 }
 0x202   : > { %v491_v18 = vmul.f32 %v1526_v15, %v483_v16 }
 0x204   : > { %v499_v19 = vadd.f32 %v1527_v17, %v491_v18 }
 0x206   : > { %v500_v20 = vpack.c.bf16 %v499_v19, %v499_v19 }
 0x208   : > { %502 = vst.msk [vmem:[#allocation2] sm:$0xf] %vm501_vm2, %v500_v20 }
 0x20f   : > { %v504_v22 = vld [vmem:[#allocation2] sm:$0xf] }
 0x210   : > { %1599 = vmatmul.mubr.msk.bf16.vlgmr.msra.gmra.mrb[0].mxu0 %vm469_vm0, %v504_v22 }
 0x211   : > { %1611 = vmatpush3.bf16.msra.mxu0 %v1821_v21  ;;  %1614 = vmatprep.mubr.msk.bf16.mxu0 %vm2123_vm1, %v2122_v8 }
 0x212   : > { %1612 = vmatprep.subr.bf16.mxu0 %v2122_v8 }
 0x215   : > { %1613 = vmatpush3.bf16.msra.mxu0 %v1823_v24 }
 0x216   : > { %1626 = vmatprep.subr.bf16.mxu0 %v2122_v8 }
 0x2e3   : > { %v559_v25 = vpop.f32.mrb[0].mxu0 }
 0x2e4   : > { %v2476_v26 = vpack.c.bf16 %v559_v25, %v559_v25  ;;  %v1600_v27 = vpop.f32.mrb[1].mxu0 }
 0x2e5   : > { %v562_v28 = vpop.f32.mrb[2].mxu0 }
 0x2e6   : > { %695 = vrot.lane.b32.xlu1 %v2476_v26, %s2124_s1  ;;  %v1601_v29 = vpop.f32.mrb[3].mxu0  ;;  %1607 = vmatmul.mubr.msk.bf16.vlgmr.msra.gmra.mrb[0].mxu1 %vm469_vm0, %v2476_v26  ;;  %v630_v30 = vmul.bf16 %v2476_v26, %v2476_v26 }
 0x2e7   : > { %1619 = vmatpush3.bf16.msra.mxu1 %v1820_v10  ;;  %1622 = vmatprep.mubr.msk.bf16.mxu1 %vm2123_vm1, %v2122_v8 }
 0x2e8   : > { %1615 = vmatmul.mubr.msk.bf16.vlgmr.msra.gmra.mrb[4].mxu0 %vm469_vm0, %v630_v30  ;;  %1620 = vmatprep.subr.bf16.mxu1 %v2122_v8 }
 0x2e9   : > { %1627 = vmatpush3.bf16.msra.mxu0 %v1821_v21  ;;  %1630 = vmatprep.mubr.msk.bf16.mxu0 %vm2123_vm1, %v2122_v8 }
 0x2ea   : > { %741 = vrot.lane.b32.xlu1 %v630_v30, %s2124_s1  ;;  %1628 = vmatprep.subr.bf16.mxu0 %v2122_v8  ;;  %s2134_s1 = smov 24  }
 0x2eb   : > { %1621 = vmatpush3.bf16.msra.mxu1 %v1822_v23 }
 0x2ec   : > { %1634 = vmatprep.subr.bf16.mxu1 %v2122_v8 }
 0x2ed   : > { %1629 = vmatpush3.bf16.msra.mxu0 %v1823_v24 }
 0x2ee   : > { %1640 = vmatprep.subr.bf16.mxu0 %v2122_v8 }
 0x358   : > { %v696_v31 = vpop.permute.xlu1 %695 }
 0x359   : > { %1623 = vmatmul.mubr.msk.bf16.vlgmr.msra.gmra.mrb[4].mxu1 %vm469_vm0, %v696_v31 }
 0x35a   : > { %1636 = vmatprep.mubr.msk.bf16.mxu1 %vm2123_vm1, %v2122_v8 }
 0x35c   : > { %v742_v32 = vpop.permute.xlu1 %741 }
 0x35d   : > { %1631 = vmatmul.mubr.msk.bf16.vlgmr.msra.gmra.mrb[8].mxu0 %vm469_vm0, %v742_v32 }
 0x35e   : > { %1642 = vmatprep.mubr.msk.bf16.mxu0 %vm2123_vm1, %v2122_v8 }
 0x3b9   : > { %v624_v37 = vpop.f32.mrb[0].mxu1 }
 0x3ba   : > { %v1608_v38 = vpop.f32.mrb[1].mxu1 }
 0x3bb   : > { %v627_v40 = vpop.f32.mrb[2].mxu1  ;;  %v680_v41 = vpop.f32.mrb[4].mxu0 }
 0x3bc   : > { %v686_v42 = vsub.f32 %v624_v37, %v680_v41  ;;  %v1609_v43 = vpop.f32.mrb[3].mxu1  ;;  %v1616_v44 = vpop.f32.mrb[5].mxu0 }
 0x3bd   : > { %v683_v45 = vpop.f32.mrb[6].mxu0 }
 0x3be   : > { %v691_v46 = vadd.f32 %v690_v39, %v686_v42  ;;  %v1617_v47 = vpop.f32.mrb[7].mxu0 }
 0x3c0   : > { %v692_v48 = vmul.f32 1.442695, %v691_v46 }
 0x3c2   : > { %1828 = vpow2.f32 %v692_v48 }
 0x3cc   : > { %v1829_v49 = vpop.eup %1828 }
 0x3cd   : > { %v794_v50 = vpack.c.bf16 %v1829_v49, %v1829_v49 }
 0x3cf   : > { %908 = vrot.lane.b32.xlu1 %v794_v50, %s2125_s23 }
 0x42c   : > { %v734_v52 = vpop.f32.mrb[4].mxu1 }
 0x42d   : > { %v1624_v53 = vpop.f32.mrb[5].mxu1 }
 0x42e   : > { %v737_v54 = vpop.f32.mrb[6].mxu1 }
 0x42f   : > { %v1625_v55 = vpop.f32.mrb[7].mxu1 }
 0x430   : > { %v780_v57 = vpop.f32.mrb[8].mxu0 }
 0x431   : > { %v786_v58 = vsub.f32 %v734_v52, %v780_v57  ;;  %v1632_v59 = vpop.f32.mrb[9].mxu0 }
 0x432   : > { %v783_v60 = vpop.f32.mrb[10].mxu0 }
 0x433   : > { %v791_v61 = vadd.f32 %v790_v56, %v786_v58  ;;  %v1633_v62 = vpop.f32.mrb[11].mxu0 }
 0x435   : > { %v792_v63 = vmul.f32 1.442695, %v791_v61 }
 0x437   : > { %1830 = vpow2.f32 %v792_v63 }
 0x441   : > { %v1831_v1 = vpop.eup %1830  ;;  %v909_v4 = vpop.permute.xlu1 %908 }
 0x442   : > { %v795_v2 = vpack.c.bf16 %v1831_v1, %v1831_v1 }
 0x444   : > { %1030 = vrot.lane.b32.xlu1 %v795_v2, %s2126_s18  ;;  %911 = vrot.lane.b32.xlu0 %v795_v2, %s2125_s23  ;;  %v801_v3 = vsel %vm796_vm3, %v795_v2, 0 }
 0x445   : > { %1635 = vmatpush3.bf16.xpose.msra.mxu1 %v801_v3 }
 0x446   : > { %1646 = vmatprep.subr.bf16.mxu1 %v2122_v8 }
 0x448   : > { %1028 = vrot.lane.b32.xlu1 %v794_v50, %s2126_s18  ;;  %s2560_s18 = scalar_lea.hbm %s2618_s8, %s1554_s14 }
 0x44c   : > { %1149 = vrot.lane.b32.xlu1 %v795_v2, %s2127_s20  ;;  %1637 = vmatmul.mubr.msk.bf16.vlgmr.msra.gmra.mrb[8].mxu1 %vm796_vm3, %v794_v50 }
 0x44d   : > { %1648 = vmatprep.mubr.msk.bf16.mxu1 %vm2123_vm1, %v2122_v8 }
 0x450   : > { %1147 = vrot.lane.b32.xlu1 %v794_v50, %s2127_s20  ;;  %s1330_s20 = scalar_lea.sflag [#allocation6], %s2427_s3 }
 0x4b6   : > { %v912_v5 = vpop.permute.xlu0 %911  ;;  %v1031_v7 = vpop.permute.xlu1 %1030 }
 0x4b7   : > { %v917_v6 = vsel %vm796_vm3, %v912_v5, 0  ;;  %v1036_v10 = vsel %vm796_vm3, %v1031_v7, 0 }
 0x4b8   : > { %1647 = vmatpush3.bf16.xpose.msra.mxu1 %v917_v6 }
 0x4b9   : > { %1658 = vmatprep.subr.bf16.mxu1 %v2122_v8 }
 0x4ba   : > { %v1029_v9 = vpop.permute.xlu1 %1028 }
 0x4be   : > { %v1150_v11 = vpop.permute.xlu1 %1149 }
 0x4bf   : > { %1649 = vmatmul.mubr.msk.bf16.vlgmr.msra.gmra.mrb[12].mxu1 %vm796_vm3, %v909_v4  ;;  %v1155_v12 = vsel %vm796_vm3, %v1150_v11, 0 }
 0x4c0   : > { %1659 = vmatpush3.bf16.xpose.msra.mxu1 %v1036_v10  ;;  %1660 = vmatprep.mubr.msk.bf16.mxu1 %vm2123_vm1, %v2122_v8 }
 0x4c1   : > { %1670 = vmatprep.subr.bf16.mxu1 %v2122_v8 }
 0x4c2   : > { %v1148_v13 = vpop.permute.xlu1 %1147 }
 0x4c7   : > { %1661 = vmatmul.mubr.msk.bf16.vlgmr.msra.gmra.mrb[16].mxu1 %vm796_vm3, %v1029_v9 }
 0x4c8   : > { %1671 = vmatpush3.bf16.xpose.msra.mxu1 %v1155_v12  ;;  %1672 = vmatprep.mubr.msk.bf16.mxu1 %vm2123_vm1, %v2122_v8 }
 0x4c9   : > { %1682 = vmatprep.subr.bf16.mxu1 %v2122_v8 }
 0x4cf   : > { %1673 = vmatmul.mubr.msk.bf16.vlgmr.msra.gmra.mrb[20].mxu1 %vm796_vm3, %v1148_v13 }
 0x4d0   : > { %1686 = vmatprep.mubr.msk.bf16.mxu1 %vm2123_vm1, %v2122_v8 }
 0x51f   : > { %v837_v14 = vpop.f32.mrb[8].mxu1 }
 0x520   : > { %v1638_v15 = vpop.f32.mrb[9].mxu1  ;;  %v843_v16 = vsel %vm796_vm3, %v837_v14, -inf }
 0x521   : > { %844 = vmax.xlane.f32.xlu1 %v843_v16  ;;  %v840_v17 = vpop.f32.mrb[10].mxu1 }
 0x522   : > { %v1639_v18 = vpop.f32.mrb[11].mxu1 }
 0x592   : > { %v953_v19 = vpop.f32.mrb[12].mxu1 }
 0x593   : > { %v1650_v20 = vpop.f32.mrb[13].mxu1  ;;  %v959_v21 = vsel %vm796_vm3, %v953_v19, -inf }
 0x594   : > { %960 = vmax.xlane.f32.xlu0 %v959_v21  ;;  %v956_v22 = vpop.f32.mrb[14].mxu1 }
 0x595   : > { %v1651_v23 = vpop.f32.mrb[15].mxu1 }
 0x59a   : > { %v1072_v24 = vpop.f32.mrb[16].mxu1 }
 0x59b   : > { %v1662_v25 = vpop.f32.mrb[17].mxu1  ;;  %v1078_v27 = vsel %vm796_vm3, %v1072_v24, -inf }
 0x59c   : > { %1079 = vmax.xlane.f32.xlu0 %v1078_v27  ;;  %v1075_v28 = vpop.f32.mrb[18].mxu1  ;;  %v1824_v27 = vld [vmem:[#allocation12] sm:$0xff]  }
 0x59d   : > { %v1663_v29 = vpop.f32.mrb[19].mxu1  ;;  %1683 = vmatpush3.bf16.msra.mxu1 %v1824_v27  ;;  %v1825_v28 = vld [vmem:[#allocation12 + $0x8] sm:$0xff]  }
 0x59e   : > { %1684 = vmatprep.subr.bf16.mxu1 %v2122_v8 }
 0x5a1   : > { %1685 = vmatpush3.bf16.msra.mxu1 %v1825_v28 }
 0x5a2   : > { %v1191_v30 = vpop.f32.mrb[20].mxu1 }
 0x5a3   : > { %v1674_v31 = vpop.f32.mrb[21].mxu1  ;;  %v1197_v32 = vsel %vm796_vm3, %v1191_v30, -inf }
 0x5a4   : > { %1198 = vmax.xlane.f32.xlu1 %v1197_v32  ;;  %v1194_v33 = vpop.f32.mrb[22].mxu1 }
 0x5a5   : > { %v1675_v34 = vpop.f32.mrb[23].mxu1 }
 0x5ae   : > { %v845_v35 = vpop.xlane.xlu1 %844 }
 0x5af   : > { %v846_v36 = vsub.f32 %v837_v14, %v845_v35 }
 0x5b1   : > { %v847_v37 = vmul.f32 1.442695, %v846_v36 }
 0x5b3   : > { %1832 = vpow2.f32 %v847_v37 }
 0x5bd   : > { %v1833_v38 = vpop.eup %1832 }
 0x5be   : > { %v849_v39 = vsel %vm796_vm3, %v1833_v38, 0.0 }
 0x5bf   : > { %850 = vadd.xlane.f32.xlu0 %v849_v39 }
 0x621   : > { %v961_v40 = vpop.xlane.xlu0 %960 }
 0x622   : > { %v962_v41 = vsub.f32 %v953_v19, %v961_v40 }
 0x624   : > { %v963_v42 = vmul.f32 1.442695, %v962_v41 }
 0x626   : > { %1834 = vpow2.f32 %v963_v42 }
 0x629   : > { %v1080_v43 = vpop.xlane.xlu0 %1079 }
 0x62a   : > { %v1081_v44 = vsub.f32 %v1072_v24, %v1080_v43 }
 0x62c   : > { %v1082_v45 = vmul.f32 1.442695, %v1081_v44 }
 0x62e   : > { %1836 = vpow2.f32 %v1082_v45 }
 0x630   : > { %v1835_v46 = vpop.eup %1834 }
 0x631   : > { %v965_v47 = vsel %vm796_vm3, %v1835_v46, 0.0  ;;  %v1199_v50 = vpop.xlane.xlu1 %1198 }
 0x632   : > { %966 = vadd.xlane.f32.xlu1 %v965_v47  ;;  %v1200_v51 = vsub.f32 %v1191_v30, %v1199_v50 }
 0x634   : > { %v1201_v52 = vmul.f32 1.442695, %v1200_v51 }
 0x636   : > { %1838 = vpow2.f32 %v1201_v52 }
 0x638   : > { %v1837_v48 = vpop.eup %1836 }
 0x639   : > { %v1084_v49 = vsel %vm796_vm3, %v1837_v48, 0.0 }
 0x63a   : > { %1085 = vadd.xlane.f32.xlu0 %v1084_v49 }
 0x640   : > { %v1839_v53 = vpop.eup %1838 }
 0x641   : > { %v1203_v54 = vsel %vm796_vm3, %v1839_v53, 0.0 }
 0x643   : > { %971 = vrot.lane.b32.xlu1 %v2476_v26, %s2128_s22  ;;  %s2135_s22 = smov [#allocation15]  }
 0x64c   : > { %v851_v55 = vpop.xlane.xlu0 %850 }
 0x64d   : > { %1840 = vrcp.f32 %v851_v55 }
 0x650   : > { %855 = vrot.lane.b32.xlu0 %v2476_v26, %s2129_s21  ;;  %s2022_s21 = sshll.u32 %s2135_s22, 4  ;;  %s2023_s21 = int_to_ptr.vmem [resolvable:$false] %s2022_s21 }
 0x651   : > { %p2025_p11 = scmp.lt.s32.totalorder %s2562_s25, %s2023_s21 }
 0x654   : > { %1209 = vrot.lane.b32.xlu0 %v2476_v26, %s2130_s11  ;;  %s2024_s11 = scalar_lea.vmem %s2023_s21, 256 }
 0x655   : > { %p2026_p12 = scmp.lt.s32.totalorder %s2024_s11, %s2018_s30 }
 0x657   : > { %v1841_v57 = vpop.eup %1840  ;;  %p2027_p0 = por %p2026_p12, %p2025_p11 }
 0x658   : > { %v853_v59 = vmul.f32 %v1841_v57, %v1833_v38 }
 0x659   : > { %p2028_p8 = pnand %p2027_p0, %p2021_p7 }
 0x65a   : > { %v854_v63 = vpack.c.bf16 %v853_v59, %v853_v59 }
 0x667   : > { %1204 = vadd.xlane.f32.xlu1 %v1203_v54 }
 0x678   : > { %1090 = vrot.lane.b32.xlu1 %v2476_v26, %s2131_s2 }
 0x6bf   : > { %v967_v56 = vpop.xlane.xlu1 %966 }
 0x6c0   : > { %1842 = vrcp.f32 %v967_v56 }
 0x6c3   : > { %v972_v62 = vpop.permute.xlu1 %971 }
 0x6c4   : > { %v977_v2 = vsel %vm860_vm4, %v972_v62, 0 }
 0x6c7   : > { %v1086_v58 = vpop.xlane.xlu0 %1085 }
 0x6c8   : > { %1844 = vrcp.f32 %v1086_v58 }
 0x6ca   : > { %v1843_v1 = vpop.eup %1842 }
 0x6cb   : > { %v856_v60 = vpop.permute.xlu0 %855  ;;  %v969_v26 = vmul.f32 %v1843_v1, %v1835_v46 }
 0x6cc   : > { %v862_v61 = vsel %vm860_vm4, %v856_v60, 0 }
 0x6cd   : > { %1641 = vmatpush3.bf16.msra.mxu0 %v862_v61  ;;  %v970_v3 = vpack.c.bf16 %v969_v26, %v969_v26 }
 0x6ce   : > { %1652 = vmatprep.subr.bf16.mxu0 %v2122_v8 }
 0x6cf   : > { %v1210_v10 = vpop.permute.xlu0 %1209 }
 0x6d0   : > { %1643 = vmatmul.mubr.msk.bf16.vlgmr.msra.gmra.mrb[12].mxu0 %vm796_vm3, %v854_v63  ;;  %v1215_v12 = vsel %vm860_vm4, %v1210_v10, 0 }
 0x6d1   : > { %1653 = vmatpush3.bf16.msra.mxu0 %v977_v2  ;;  %1654 = vmatprep.mubr.msk.bf16.mxu0 %vm2123_vm1, %v2122_v8 }
 0x6d2   : > { %1664 = vmatprep.subr.bf16.mxu0 %v2122_v8  ;;  %v1845_v4 = vpop.eup %1844 }
 0x6d3   : > { %v1088_v6 = vmul.f32 %v1845_v4, %v1837_v48 }
 0x6d5   : > { %v1089_v11 = vpack.c.bf16 %v1088_v6, %v1088_v6 }
 0x6d8   : > { %1655 = vmatmul.mubr.msk.bf16.vlgmr.msra.gmra.mrb[16].mxu0 %vm796_vm3, %v970_v3 }
 0x6d9   : > { %1666 = vmatprep.mubr.msk.bf16.mxu0 %vm2123_vm1, %v2122_v8 }
 0x6f4   : > { %v1205_v5 = vpop.xlane.xlu1 %1204 }
 0x6f5   : > { %1846 = vrcp.f32 %v1205_v5 }
 0x6f8   : > { %v1091_v7 = vpop.permute.xlu1 %1090 }
 0x6f9   : > { %v1096_v9 = vsel %vm860_vm4, %v1091_v7, 0 }
 0x6fa   : > { %1665 = vmatpush3.bf16.msra.mxu0 %v1096_v9 }
 0x6fb   : > { %1676 = vmatprep.subr.bf16.mxu0 %v2122_v8 }
 0x6fd   : > { %1667 = vmatmul.mubr.msk.bf16.vlgmr.msra.gmra.mrb[20].mxu0 %vm796_vm3, %v1089_v11 }
 0x6fe   : > { %1677 = vmatpush3.bf16.msra.mxu0 %v1215_v12  ;;  %1678 = vmatprep.mubr.msk.bf16.mxu0 %vm2123_vm1, %v2122_v8 }
 0x6ff   : > { %v1847_v13 = vpop.eup %1846 }
 0x700   : > { %v1207_v14 = vmul.f32 %v1847_v13, %v1839_v53 }
 0x702   : > { %v1208_v15 = vpack.c.bf16 %v1207_v14, %v1207_v14 }
 0x705   : > { %1679 = vmatmul.mubr.msk.bf16.vlgmr.msra.gmra.mrb[24].mxu0 %vm796_vm3, %v1208_v15 }
 0x7a3   : > { %v898_v16 = vpop.f32.mrb[12].mxu0 }
 0x7a4   : > { %v904_v17 = vpack.c.bf16 %v898_v16, %v898_v16  ;;  %v1644_v18 = vpop.f32.mrb[13].mxu0 }
 0x7a5   : > { %v901_v19 = vpop.f32.mrb[14].mxu0 }
 0x7a6   : > { %906 = vst.msk [vmem:[#allocation3] sm:$0xf] %vm905_vm5, %v904_v17  ;;  %v1645_v20 = vpop.f32.mrb[15].mxu0 }
 0x7ab   : > { %v1013_v21 = vpop.f32.mrb[16].mxu0 }
 0x7ac   : > { %v1557_v22 = vpack.c.bf16 %v1013_v21, %v1013_v21  ;;  %v1656_v23 = vpop.f32.mrb[17].mxu0 }
 0x7ad   : > { %v1016_v24 = vpop.f32.mrb[18].mxu0 }
 0x7ae   : > { %1023 = vrot.lane.b32.xlu1 %v1557_v22, %s2132_s12  ;;  %v1657_v25 = vpop.f32.mrb[19].mxu0 }
 0x7d0   : > { %v1132_v29 = vpop.f32.mrb[20].mxu0 }
 0x7d1   : > { %v1558_v30 = vpack.c.bf16 %v1132_v29, %v1132_v29  ;;  %v1668_v31 = vpop.f32.mrb[21].mxu0 }
 0x7d2   : > { %v1135_v32 = vpop.f32.mrb[22].mxu0 }
 0x7d3   : > { %1142 = vrot.lane.b32.xlu0 %v1558_v30, %s2133_s13  ;;  %v1669_v33 = vpop.f32.mrb[23].mxu0 }
 0x7d8   : > { %v1251_v34 = vpop.f32.mrb[24].mxu0 }
 0x7d9   : > { %v1559_v35 = vpack.c.bf16 %v1251_v34, %v1251_v34  ;;  %v1680_v36 = vpop.f32.mrb[25].mxu0 }
 0x7da   : > { %v1254_v37 = vpop.f32.mrb[26].mxu0 }
 0x7db   : > { %1261 = vrot.lane.b32.xlu1 %v1559_v35, %s2134_s1  ;;  %v1681_v8 = vpop.f32.mrb[27].mxu0 }
 0x820   : > { %v1024_v38 = vpop.permute.xlu1 %1023 }
 0x821   : > { %1027 = vst.msk [vmem:[#allocation3] sm:$0xf] %vm1026_vm6, %v1024_v38 }
 0x845   : > { %v1143_v39 = vpop.permute.xlu0 %1142 }
 0x846   : > { %1146 = vst.msk [vmem:[#allocation3] sm:$0xf] %vm1145_vm7, %v1143_v39 }
 0x84d   : > { %v1262_v40 = vpop.permute.xlu1 %1261 }
 0x84e   : > { %1265 = vst.msk [vmem:[#allocation3] sm:$0xf] %vm1264_vm8, %v1262_v40 }
 0x855   : > { %v1267_v41 = vld [vmem:[#allocation3] sm:$0xf] }
 0x856   : > { %1687 = vmatmul.mubr.msk.bf16.vlgmr.msra.gmra.mrb[24].mxu1 %vm469_vm0, %v1267_v41 }
 0x929   : > { %v1321_v42 = vpop.f32.mrb[24].mxu1 }
 0x92a   : > { %v1327_v43 = vadd.f32 %v1321_v42, %v1266_v0  ;;  %v1688_v44 = vpop.f32.mrb[25].mxu1 }
 0x92b   : > { %v1324_v45 = vpop.f32.mrb[26].mxu1 }
 0x92c   : > { %1328 = vst.msk [vmem:[%s453_s19] sm:$0xff] %vm469_vm0, %v1327_v43  ;;  %v1689_v46 = vpop.f32.mrb[27].mxu1 }
 0x92d   : > { %2031 = shalt.err (!%p2028_p8)
}
 0x92e   : > { %s2032_s3 = scalar_lea.hbm %s2560_s18, 128  ;;  %s2036_s13 = scalar_lea.hbm %s2618_s8, 256 }
 0x92f   : > { %p2033_p9 = scmp.ne.s32.totalorder %s2560_s18, %s2032_s3  ;;  %p2037_p10 = scmp.lt.u32.totalorder %s2560_s18, %s2618_s8 }
 0x930   : > { %p2038_p4 = scmp.lt.u32.totalorder %s2036_s13, %s2032_s3  ;;  %p2040_p6 = scmp.lt.u32.totalorder %s2032_s3, %s2560_s18 }
 0x931   : > { %p2034_p1 = pnand %p2033_p9, %p2649_p2 }
 0x932   : > { %p2039_p13 = por %p2038_p4, %p2037_p10 }
 0x933   : > { %p2035_p3 = pneg %p2034_p1 }
 0x934   : > { %p2041_p5 = por %p2040_p6, %p2039_p13 }
 0x936   : > { %p2042_p7 = pnand %p2041_p5, %p2035_p3 }
 0x938   : > { %2045 = shalt.err (!%p2042_p7)
}
 0x939   : > { %1712 = dma.vmem_to_hbm [thread:$0]  (%p2649_p2), %s2562_s25, 128, %s2560_s18, %s1330_s20  }
 0x93a PF: > { %s1355_s14 = sand.u32 1, %s2092_s27   ;;  %p2650_p11 = scmp.ne.s32.totalorder %s2645_s17, 0 }
 0x93b   : > { %p2651_p12 = scmp.ge.s32.totalorder %s2112_s10, 2  ;;  %s1356_s16 = scalar_lea.sflag [#allocation6], %s1355_s14 }
 0x93d   : > { %p1735_p0 = pnand %p2651_p12, %p2650_p11 }
 0x93f   : > { %2087 = dma.done.wait (!%p1735_p0), %s1356_s16, 128  }
 0x940   : > { %2089 = vsyncadd (!%p1735_p0), %s1356_s16, 4294967168  ;;  %s27_s10 = sadd.s32 1, %s2112_s10   ;;  %s2652_s27 = smov %s2096_s28 }
 0x941   : > { %p24_p8 = scmp.ge.s32.totalorder %s27_s10, 4   ;;  %s2653_s28 = smov %s2100_s29 }
 0x942   : > { %s2654_s29 = smov %s2378_s24  ;;  %s2655_s30 = smov %s2108_s9 }
 0x943   : > { %s2656_s9 = smov %s2658_s26  ;;  %26 = sbr.rel (!%p24_p8) target bundleno = 13 (0xd), region = 130 }
 0x94a   :  { %1361 = vsyncpa [#allocation5], 1 }
 0x94b   :  { %1363 = vsyncpa [#allocation5 + $0x1], 1 }
 0x94c   :  { %1364 = vsyncpa [#allocation8], 1 }
 0x94d   :  { %1365 = vsyncpa [#allocation11], 1 }
 0x94e   :  { %1366 = vsyncpa [#allocation14], 1 }
 0x94f   :  { %1367 = vsyncpa [#allocation6], 1 }
 0x950   :  { %1369 = vsyncpa [#allocation6 + $0x1], 1 }

</bundles_post_ra>
